<compile_context>
chip_gen: v5e
topology: v5e:2x2
jax: 0.10.0
libtpu: 0.0.40
codegen_flags: <defaults>
</compile_context>

<pallas_src>
import functools
import numpy as np

import jax
import jax.numpy as jnp
from jax import lax
from jax.experimental import pallas as pl
from jax.experimental.pallas import tpu as pltpu

PAD = 0            # Constants.PAD
LN_EPS = 1e-5      # nn.LayerNorm default eps
NEG_INF = -1e30    # finite mask fill (masked keys get ~0 prob; fully-masked rows are zeroed
                   # downstream by non_pad_mask, matching the useful part of the torch behavior)


def _round_up(x, m):
    return (x + m - 1) // m * m


# --------------------------------------------------------------------------------------
# In-kernel helpers (operate on VMEM values)
# --------------------------------------------------------------------------------------

def _layer_norm(x, g, b):
    mean = jnp.mean(x, axis=-1, keepdims=True)
    c = x - mean
    var = jnp.mean(c * c, axis=-1, keepdims=True)
    return c * lax.rsqrt(var + LN_EPS) * g + b


def _proj(x, w_bf16, b_f32):
    """(L, D) f32  @  (D, N) bf16  ->  (L, N) f32, + f32 bias. MXU runs bf16, accumulates f32."""
    return jnp.dot(x.astype(jnp.bfloat16), w_bf16,
                   preferred_element_type=jnp.float32) + b_f32


def _attend(q, k, v, bias, *, n_head, d_k, d_v, inv_temp):
    """Scaled-dot-product attention for all heads; additive mask bias; exact softmax.

    Per-head loop uses static lane slices only (guaranteed Mosaic lowering).
    TODO(synk): replace with a single head-batched contraction ((H,Lq,dk)x(H,Lk,dk)) once the
                head-major relayout is validated on the target Mosaic version.
    """
    outs = []
    for h in range(n_head):
        qh = q[:, h * d_k:(h + 1) * d_k].astype(jnp.bfloat16)
        kh = k[:, h * d_k:(h + 1) * d_k].astype(jnp.bfloat16)
        vh = v[:, h * d_v:(h + 1) * d_v].astype(jnp.bfloat16)
        # (qh @ kh^T): transpose folded into dot_general dimension numbers.
        s = lax.dot_general(qh, kh, (((1,), (1,)), ((), ())),
                            preferred_element_type=jnp.float32)
        s = s * inv_temp + bias                       # additive mask bias (precomputed)
        s = s - jnp.max(s, axis=-1, keepdims=True)
        p = jnp.exp(s)
        p = p / jnp.sum(p, axis=-1, keepdims=True)    # exact division (parity with reference)
        outs.append(jnp.dot(p.astype(jnp.bfloat16), vh,
                            preferred_element_type=jnp.float32))
    return jnp.concatenate(outs, axis=-1)             # (Lq, H*dv)


def _out_proj_ln(attn_out, resid, wo, bo, lg, lb):
    """Single output-projection matmul + residual + LayerNorm."""
    y = jnp.dot(attn_out.astype(jnp.bfloat16), wo,
                preferred_element_type=jnp.float32) + bo
    return _layer_norm(y + resid, lg, lb)


# --------------------------------------------------------------------------------------
# Fused decoder layer kernel (one grid step = one batch element; whole layer in VMEM)
# --------------------------------------------------------------------------------------

def _decoder_layer_kernel(
        dec_ref, enc_ref, npm_ref, slf_bias_ref, enc_bias_ref,
        s_wqkv, s_bqkv, s_wo, s_bo, s_lg, s_lb,
        e_wq, e_bq, e_wkv, e_bkv, e_wo, e_bo, e_lg, e_lb,
        f_w1, f_b1, f_w2, f_b2, f_lg, f_lb,
        o_ref, *, n_head, d_k, d_v, inv_temp, out_pad):
    x = dec_ref[0]                # (Lt, D)  f32
    e = enc_ref[0]                # (Ls, D)  f32
    npm = npm_ref[0]              # (Lt, 1)  f32
    sb = slf_bias_ref[0]          # (Lt, Lt) f32 additive bias
    eb = enc_bias_ref[0]          # (Lt, Ls) f32 additive bias
    D = x.shape[-1]
    Hk = n_head * d_k
    Hv = n_head * d_v
    attend = functools.partial(_attend, n_head=n_head, d_k=d_k, d_v=d_v,
                               inv_temp=inv_temp)

    # ---- masked self-attention: single merged QKV matmul ----
    qkv = _proj(x, s_wqkv[...], s_bqkv[...])                       # (Lt, 2*Hk + Hv)
    q, k, v = qkv[:, :Hk], qkv[:, Hk:2 * Hk], qkv[:, 2 * Hk:]
    out = _out_proj_ln(attend(q, k, v, sb), x,
                       s_wo[...], s_bo[...], s_lg[...], s_lb[...]) * npm

    # ---- encoder-decoder attention: Q matmul + merged KV matmul ----
    q = _proj(out, e_wq[...], e_bq[...])                           # (Lt, Hk)
    kv = _proj(e, e_wkv[...], e_bkv[...])                          # (Ls, Hk + Hv)
    k, v = kv[:, :Hk], kv[:, Hk:]
    out = _out_proj_ln(attend(q, k, v, eb), out,
                       e_wo[...], e_bo[...], e_lg[...], e_lb[...]) * npm

    # ---- position-wise FFN (Conv1d k=1 == token-major matmuls) + residual + LN ----
    h1 = jnp.maximum(_proj(out, f_w1[...], f_b1[...]), 0.0)
    f = _proj(h1, f_w2[...], f_b2[...])
    f = _layer_norm(f + out, f_lg[...], f_lb[...]) * npm

    # ---- lane-dense store: pad feature dim to a multiple of 128 ----
    if out_pad > D:
        f = jnp.concatenate([f, jnp.zeros((f.shape[0], out_pad - D), f.dtype)], axis=-1)
    o_ref[0] = f.astype(o_ref.dtype)


def decoder_layer_fused(dec_input, enc_output, non_pad_mask, slf_bias, enc_bias,
                        p, n_head, d_k, d_v):
    B, Lt, D = dec_input.shape
    Ls = enc_output.shape[1]
    Hk, Hv = n_head * d_k, n_head * d_v
    d_inner = p["pos_ffn"]["w1"].shape[1]
    out_pad = _round_up(D, 128)     # lane-dense output store; sliced back by the caller

    bf = lambda w: w.astype(jnp.bfloat16)
    b2 = lambda v: v.reshape(1, -1)

    sa, ea, ff = p["slf_attn"], p["enc_attn"], p["pos_ffn"]
    weights = [
        # self-attn: merged QKV weight/bias, output proj, LN
        bf(jnp.concatenate([sa["w_qs"], sa["w_ks"], sa["w_vs"]], axis=1)),   # (D, 2Hk+Hv)
        b2(jnp.concatenate([sa["b_qs"], sa["b_ks"], sa["b_vs"]])),
        bf(sa["w_fc"]), b2(sa["b_fc"]), b2(sa["ln_g"]), b2(sa["ln_b"]),
        # enc-attn: Q weight/bias, merged KV weight/bias, output proj, LN
        bf(ea["w_qs"]), b2(ea["b_qs"]),
        bf(jnp.concatenate([ea["w_ks"], ea["w_vs"]], axis=1)),              # (D, Hk+Hv)
        b2(jnp.concatenate([ea["b_ks"], ea["b_vs"]])),
        bf(ea["w_fc"]), b2(ea["b_fc"]), b2(ea["ln_g"]), b2(ea["ln_b"]),
        # FFN
        bf(ff["w1"]), b2(ff["b1"]), bf(ff["w2"]), b2(ff["b2"]),
        b2(ff["ln_g"]), b2(ff["ln_b"]),
    ]

    act_specs = [
        pl.BlockSpec((1, Lt, D), lambda b: (b, 0, 0)),    # dec_input
        pl.BlockSpec((1, Ls, D), lambda b: (b, 0, 0)),    # enc_output
        pl.BlockSpec((1, Lt, 1), lambda b: (b, 0, 0)),    # non_pad_mask
        pl.BlockSpec((1, Lt, Lt), lambda b: (b, 0, 0)),   # self-attn additive bias
        pl.BlockSpec((1, Lt, Ls), lambda b: (b, 0, 0)),   # enc-dec additive bias
    ]
    weight_specs = [pl.BlockSpec(w.shape, lambda b: (0, 0)) for w in weights]

    # Advisory cost estimate so XLA can schedule/overlap the per-layer custom calls.
    H = n_head
    flops = B * (
        2 * Lt * D * (2 * Hk + Hv)                           # merged self QKV
        + H * (2 * Lt * Lt * d_k + 2 * Lt * Lt * d_v)        # self scores + PV
        + 2 * Lt * Hv * D                                    # self out proj
        + 2 * Lt * D * Hk + 2 * Ls * D * (Hk + Hv)           # enc Q + merged KV
        + H * (2 * Lt * Ls * d_k + 2 * Lt * Ls * d_v)        # enc scores + PV
        + 2 * Lt * Hv * D                                    # enc out proj
        + 2 * Lt * D * d_inner * 2                           # FFN
    )
    transcendentals = B * H * (Lt * Lt + Lt * Ls)
    acts = [dec_input, enc_output, non_pad_mask, slf_bias, enc_bias]
    bytes_accessed = int(sum(a.nbytes for a in acts)
                         + sum(w.nbytes for w in weights)
                         + B * Lt * out_pad * 4)
    ce = pl.CostEstimate(flops=int(flops), transcendentals=int(transcendentals),
                         bytes_accessed=bytes_accessed)

    # Explicit VMEM budget (v5e scoped default is only 16 MiB): double-buffered activation/output
    # blocks + weights (constant index -> single copy), with generous headroom.
    per_step_act = (sum(a.nbytes for a in acts) // B) * 2
    resident = per_step_act + 2 * sum(w.nbytes for w in weights) + 2 * Lt * out_pad * 4
    vmem_limit = int(min(100 * 2 ** 20, max(32 * 2 ** 20, 4 * resident)))

    kernel = functools.partial(_decoder_layer_kernel, n_head=n_head, d_k=d_k,
                               d_v=d_v, inv_temp=1.0 / float(np.sqrt(d_k)),
                               out_pad=out_pad)
    return pl.pallas_call(
        kernel,
        out_shape=jax.ShapeDtypeStruct((B, Lt, out_pad), jnp.float32),
        grid=(B,),
        in_specs=act_specs + weight_specs,
        out_specs=pl.BlockSpec((1, Lt, out_pad), lambda b: (b, 0, 0)),
        compiler_params=pltpu.CompilerParams(
            dimension_semantics=("parallel",),       # v7x: both TCs split the batch axis
            vmem_limit_bytes=vmem_limit),
        cost_estimate=ce,
    )(dec_input, enc_output, non_pad_mask, slf_bias, enc_bias, *weights)


# --------------------------------------------------------------------------------------
# Shared-weight output projection: logits = (x @ emb_w^T) * d_model**-0.5   (no bias)
# Tiled over (row tiles, vocab tiles); bf16 operands, f32 accumulation; lane-dense output.
# --------------------------------------------------------------------------------------

def _logits_kernel(x_ref, w_ref, o_ref, *, scale):
    y = lax.dot_general(x_ref[...], w_ref[...], (((1,), (1,)), ((), ())),
                        preferred_element_type=jnp.float32)
    o_ref[...] = (y * scale).astype(o_ref.dtype)


def shared_output_logits(x2d, emb_w, scale, *, tm=128, tv=512):
    M, D = x2d.shape
    V = emb_w.shape[0]

    tm = int(min(tm, _round_up(M, 8)))
    Mp = _round_up(M, tm)
    Vp = _round_up(V, 128)
    tv = int(min(tv, Vp))
    Vp = _round_up(Vp, tv)

    x_p = x2d if Mp == M else jnp.pad(x2d, ((0, Mp - M), (0, 0)))
    w_p = emb_w if Vp == V else jnp.pad(emb_w, ((0, Vp - V), (0, 0)))
    x_p = x_p.astype(jnp.bfloat16)
    w_p = w_p.astype(jnp.bfloat16)

    ce = pl.CostEstimate(flops=int(2 * Mp * Vp * D), transcendentals=0,
                         bytes_accessed=int(x_p.nbytes + w_p.nbytes + Mp * Vp * 4))

    out = pl.pallas_call(
        functools.partial(_logits_kernel, scale=float(scale)),
        out_shape=jax.ShapeDtypeStruct((Mp, Vp), jnp.float32),
        grid=(Mp // tm, Vp // tv),
        in_specs=[pl.BlockSpec((tm, D), lambda i, j: (i, 0)),
                  pl.BlockSpec((tv, D), lambda i, j: (j, 0))],
        out_specs=pl.BlockSpec((tm, tv), lambda i, j: (i, j)),
        compiler_params=pltpu.CompilerParams(
            dimension_semantics=("parallel", "parallel")),
        cost_estimate=ce,
    )(x_p, w_p)
    return out[:M, :V]


# --------------------------------------------------------------------------------------
# Model glue (embeddings, masks) — plain JAX
# --------------------------------------------------------------------------------------

def get_sinusoid_encoding_table(n_position, d_hid, padding_idx=None):
    def cal_angle(position, hid_idx):
        return position / np.power(10000, 2 * (hid_idx // 2) / d_hid)

    table = np.array(
        [[cal_angle(pos, j) for j in range(d_hid)] for pos in range(n_position)],
        dtype=np.float64,
    )
    table[:, 0::2] = np.sin(table[:, 0::2])
    table[:, 1::2] = np.cos(table[:, 1::2])
    if padding_idx is not None:
        table[padding_idx] = 0.0
    return jnp.asarray(table, dtype=jnp.float32)


def _build_masks(src_seq, tgt_seq):
    B, Lt = tgt_seq.shape
    Ls = src_seq.shape[1]
    non_pad_mask = (tgt_seq != PAD).astype(jnp.float32)[:, :, None]                 # (B, Lt, 1)
    subseq = jnp.triu(jnp.ones((Lt, Lt), jnp.float32), k=1)[None, :, :]             # (1, Lt, Lt)
    keypad = (tgt_seq == PAD).astype(jnp.float32)[:, None, :]                       # (B, 1, Lt)
    slf_bias = jnp.where((keypad + subseq) > 0, NEG_INF, 0.0).astype(jnp.float32)   # (B, Lt, Lt)
    enc_bias = jnp.where(
        jnp.broadcast_to((src_seq == PAD)[:, None, :], (B, Lt, Ls)),
        NEG_INF, 0.0).astype(jnp.float32)                                           # (B, Lt, Ls)
    return non_pad_mask, slf_bias, enc_bias


def just_decoder_forward(params, cfg, src_seq, src_pos, tgt_seq, tgt_pos):
    n_head, d_k, d_v, d_model = cfg["n_head"], cfg["d_k"], cfg["d_v"], cfg["d_model"]

    # tgt_seq, tgt_pos = tgt_seq[:, :-1], tgt_pos[:, :-1]
    tgt_seq = tgt_seq[:, :-1]
    tgt_pos = tgt_pos[:, :-1]

    emb_w = params["emb_weight"]   # shared src/tgt embedding and output projection weight

    # --- encoder (Only_Embed) ---
    enc_output = (jnp.take(emb_w, src_seq, axis=0)
                  + jnp.take(params["enc_pos_table"], src_pos, axis=0))

    # --- decoder masks as additive biases ---
    non_pad_mask, slf_bias, enc_bias = _build_masks(src_seq, tgt_seq)

    # --- decoder: one fused Pallas kernel per layer ---
    B, Lt = tgt_seq.shape
    dec_output = (jnp.take(emb_w, tgt_seq, axis=0)
                  + jnp.take(params["dec_pos_table"], tgt_pos, axis=0))
    for layer_p in params["layers"]:
        out = decoder_layer_fused(dec_output, enc_output, non_pad_mask,
                                  slf_bias, enc_bias, layer_p, n_head, d_k, d_v)
        dec_output = out if out.shape[-1] == d_model else out[:, :, :d_model]

    # --- shared-weight output projection, scaled by d_model ** -0.5 ---
    logits = shared_output_logits(dec_output.reshape(B * Lt, d_model), emb_w,
                                  float(d_model) ** -0.5)
    return logits.reshape(B, Lt, emb_w.shape[0])


# --------------------------------------------------------------------------------------
# Pure-JAX f32 reference (same math; exact softmax) for a correctness check in __main__
# --------------------------------------------------------------------------------------

def _ref_forward(params, cfg, src_seq, src_pos, tgt_seq, tgt_pos):
    n_head, d_k, d_v, d_model = cfg["n_head"], cfg["d_k"], cfg["d_v"], cfg["d_model"]
    tgt_seq = tgt_seq[:, :-1]
    tgt_pos = tgt_pos[:, :-1]
    emb_w = params["emb_weight"]

    enc = jnp.take(emb_w, src_seq, 0) + jnp.take(params["enc_pos_table"], src_pos, 0)
    dec = jnp.take(emb_w, tgt_seq, 0) + jnp.take(params["dec_pos_table"], tgt_pos, 0)
    npm, slf_bias, enc_bias = _build_masks(src_seq, tgt_seq)

    def ln(x, g, b):
        mean = jnp.mean(x, -1, keepdims=True)
        var = jnp.mean((x - mean) ** 2, -1, keepdims=True)
        return (x - mean) * lax.rsqrt(var + LN_EPS) * g + b

    def mha(xq, xkv, bias, m):
        q = xq @ m["w_qs"] + m["b_qs"]
        k = xkv @ m["w_ks"] + m["b_ks"]
        v = xkv @ m["w_vs"] + m["b_vs"]
        Bn, Lq = q.shape[:2]
        Lk = k.shape[1]
        qh = q.reshape(Bn, Lq, n_head, d_k).transpose(0, 2, 1, 3)
        kh = k.reshape(Bn, Lk, n_head, d_k).transpose(0, 2, 1, 3)
        vh = v.reshape(Bn, Lk, n_head, d_v).transpose(0, 2, 1, 3)
        s = jnp.einsum('bhqd,bhkd->bhqk', qh, kh) / np.sqrt(d_k) + bias[:, None]
        p = jax.nn.softmax(s, axis=-1)
        o = jnp.einsum('bhqk,bhkd->bhqd', p, vh).transpose(0, 2, 1, 3)
        o = o.reshape(Bn, Lq, n_head * d_v)
        return ln(o @ m["w_fc"] + m["b_fc"] + xq, m["ln_g"], m["ln_b"])

    x = dec
    for lp in params["layers"]:
        x = mha(x, x, slf_bias, lp["slf_attn"]) * npm
        x = mha(x, enc, enc_bias, lp["enc_attn"]) * npm
        ff = lp["pos_ffn"]
        h = jax.nn.relu(x @ ff["w1"] + ff["b1"])
        x = ln(h @ ff["w2"] + ff["b2"] + x, ff["ln_g"], ff["ln_b"]) * npm
    return (x @ emb_w.T) * (float(d_model) ** -0.5)


# --------------------------------------------------------------------------------------
# Deterministic parameter init (shapes per module __init__; values synthetic)
# --------------------------------------------------------------------------------------

def init_params(key, cfg):
    d_model, d_inner = cfg["d_model"], cfg["d_inner"]
    n_head, d_k, d_v = cfg["n_head"], cfg["d_k"], cfg["d_v"]
    vocab = cfg["n_vocab"]

    keys = iter(jax.random.split(key, 128))

    def nrm(shape, std):
        return jax.random.normal(next(keys), shape, jnp.float32) * std

    emb = nrm((vocab, d_model), 1.0)
    emb = emb.at[PAD].set(0.0)   # padding_idx=Constants.PAD

    def mha_params():
        return dict(
            w_qs=nrm((d_model, n_head * d_k), np.sqrt(2.0 / (d_model + d_k))),
            b_qs=jnp.zeros((n_head * d_k,), jnp.float32),
            w_ks=nrm((d_model, n_head * d_k), np.sqrt(2.0 / (d_model + d_k))),
            b_ks=jnp.zeros((n_head * d_k,), jnp.float32),
            w_vs=nrm((d_model, n_head * d_v), np.sqrt(2.0 / (d_model + d_v))),
            b_vs=jnp.zeros((n_head * d_v,), jnp.float32),
            w_fc=nrm((n_head * d_v, d_model), np.sqrt(2.0 / (n_head * d_v + d_model))),
            b_fc=jnp.zeros((d_model,), jnp.float32),
            ln_g=jnp.ones((d_model,), jnp.float32),
            ln_b=jnp.zeros((d_model,), jnp.float32),
        )

    layers = []
    for _ in range(cfg["n_layers"]):
        layers.append(dict(
            slf_attn=mha_params(),
            enc_attn=mha_params(),
            pos_ffn=dict(
                w1=nrm((d_model, d_inner), np.sqrt(1.0 / d_model)),
                b1=jnp.zeros((d_inner,), jnp.float32),
                w2=nrm((d_inner, d_model), np.sqrt(1.0 / d_inner)),
                b2=jnp.zeros((d_model,), jnp.float32),
                ln_g=jnp.ones((d_model,), jnp.float32),
                ln_b=jnp.zeros((d_model,), jnp.float32),
            ),
        ))

    return dict(
        emb_weight=emb,
        enc_pos_table=get_sinusoid_encoding_table(cfg["len_max_seq_enc"] + 1, d_model,
                                                  padding_idx=0),
        dec_pos_table=get_sinusoid_encoding_table(cfg["len_max_seq_dec"] + 1, d_model,
                                                  padding_idx=0),
        layers=layers,
    )


# --------------------------------------------------------------------------------------

if __name__ == "__main__":
    cfg = dict(
        n_vocab=48,          # n_src_vocab == n_tgt_vocab (weight sharing)
        d_model=32, d_inner=64,
        n_layers=2, n_head=4, d_k=8, d_v=8,
        len_max_seq_enc=16, len_max_seq_dec=16,
    )

    key = jax.random.PRNGKey(0)
    pkey, ks, kt = jax.random.split(key, 3)
    params = init_params(pkey, cfg)

    B, Ls, Lt = 2, 10, 9
    # token ids in [1, vocab) so no PAD tokens (PAD batches are safe too: finite mask fill)
    src_seq = jax.random.randint(ks, (B, Ls), 1, cfg["n_vocab"], dtype=jnp.int32)
    tgt_seq = jax.random.randint(kt, (B, Lt), 1, cfg["n_vocab"], dtype=jnp.int32)
    src_pos = jnp.tile(jnp.arange(1, Ls + 1, dtype=jnp.int32)[None, :], (B, 1))
    tgt_pos = jnp.tile(jnp.arange(1, Lt + 1, dtype=jnp.int32)[None, :], (B, 1))

    logits = just_decoder_forward(params, cfg, src_seq, src_pos, tgt_seq, tgt_pos)
    logits = jax.block_until_ready(logits)

    assert logits.shape == (B, Lt - 1, cfg["n_vocab"]), logits.shape
    assert bool(jnp.all(jnp.isfinite(logits)))

    # correctness vs pure-JAX f32 reference (kernel matmuls are bf16 -> norm-relative check)
    ref = jax.block_until_ready(_ref_forward(params, cfg, src_seq, src_pos, tgt_seq, tgt_pos))
    rel_err = float(jnp.linalg.norm(logits - ref) / (jnp.linalg.norm(ref) + 1e-12))
    assert rel_err < 5e-2, f"relative error vs reference too large: {rel_err}"

    print("KERNEL_OK")
</pallas_src>

<mosaic_0001>
module attributes {stable_mosaic.version = 11 : i64} {
  func.func @_decoder_layer_kernel(%arg0: i32, %arg1: memref<1x8x32xf32, #tpu.memory_space<vmem>>, %arg2: memref<1x10x32xf32, #tpu.memory_space<vmem>>, %arg3: memref<1x8x1xf32, #tpu.memory_space<vmem>>, %arg4: memref<1x8x8xf32, #tpu.memory_space<vmem>>, %arg5: memref<1x8x10xf32, #tpu.memory_space<vmem>>, %arg6: memref<32x96xbf16, #tpu.memory_space<vmem>>, %arg7: memref<1x96xf32, #tpu.memory_space<vmem>>, %arg8: memref<32x32xbf16, #tpu.memory_space<vmem>>, %arg9: memref<1x32xf32, #tpu.memory_space<vmem>>, %arg10: memref<1x32xf32, #tpu.memory_space<vmem>>, %arg11: memref<1x32xf32, #tpu.memory_space<vmem>>, %arg12: memref<32x32xbf16, #tpu.memory_space<vmem>>, %arg13: memref<1x32xf32, #tpu.memory_space<vmem>>, %arg14: memref<32x64xbf16, #tpu.memory_space<vmem>>, %arg15: memref<1x64xf32, #tpu.memory_space<vmem>>, %arg16: memref<32x32xbf16, #tpu.memory_space<vmem>>, %arg17: memref<1x32xf32, #tpu.memory_space<vmem>>, %arg18: memref<1x32xf32, #tpu.memory_space<vmem>>, %arg19: memref<1x32xf32, #tpu.memory_space<vmem>>, %arg20: memref<32x64xbf16, #tpu.memory_space<vmem>>, %arg21: memref<1x64xf32, #tpu.memory_space<vmem>>, %arg22: memref<64x32xbf16, #tpu.memory_space<vmem>>, %arg23: memref<1x32xf32, #tpu.memory_space<vmem>>, %arg24: memref<1x32xf32, #tpu.memory_space<vmem>>, %arg25: memref<1x32xf32, #tpu.memory_space<vmem>>, %arg26: memref<1x8x128xf32, #tpu.memory_space<vmem>>) attributes {dimension_semantics = [#tpu.dimension_semantics<parallel>], iteration_bounds = array<i64: 2>, scalar_prefetch = 0 : i64, scratch_operands = 0 : i64, tpu.core_type = #tpu.core_type<tc>, window_params = [{transform_indices = @transform_0, window_bounds = array<i64: 1, 8, 32>}, {transform_indices = @transform_1, window_bounds = array<i64: 1, 10, 32>}, {transform_indices = @transform_2, window_bounds = array<i64: 1, 8, 1>}, {transform_indices = @transform_3, window_bounds = array<i64: 1, 8, 8>}, {transform_indices = @transform_4, window_bounds = array<i64: 1, 8, 10>}, {pipeline_mode = #tpu.pipeline_mode<synchronous>, transform_indices = @transform_5, window_bounds = array<i64: 32, 96>}, {pipeline_mode = #tpu.pipeline_mode<synchronous>, transform_indices = @transform_6, window_bounds = array<i64: 1, 96>}, {pipeline_mode = #tpu.pipeline_mode<synchronous>, transform_indices = @transform_7, window_bounds = array<i64: 32, 32>}, {pipeline_mode = #tpu.pipeline_mode<synchronous>, transform_indices = @transform_8, window_bounds = array<i64: 1, 32>}, {pipeline_mode = #tpu.pipeline_mode<synchronous>, transform_indices = @transform_9, window_bounds = array<i64: 1, 32>}, {pipeline_mode = #tpu.pipeline_mode<synchronous>, transform_indices = @transform_10, window_bounds = array<i64: 1, 32>}, {pipeline_mode = #tpu.pipeline_mode<synchronous>, transform_indices = @transform_11, window_bounds = array<i64: 32, 32>}, {pipeline_mode = #tpu.pipeline_mode<synchronous>, transform_indices = @transform_12, window_bounds = array<i64: 1, 32>}, {pipeline_mode = #tpu.pipeline_mode<synchronous>, transform_indices = @transform_13, window_bounds = array<i64: 32, 64>}, {pipeline_mode = #tpu.pipeline_mode<synchronous>, transform_indices = @transform_14, window_bounds = array<i64: 1, 64>}, {pipeline_mode = #tpu.pipeline_mode<synchronous>, transform_indices = @transform_15, window_bounds = array<i64: 32, 32>}, {pipeline_mode = #tpu.pipeline_mode<synchronous>, transform_indices = @transform_16, window_bounds = array<i64: 1, 32>}, {pipeline_mode = #tpu.pipeline_mode<synchronous>, transform_indices = @transform_17, window_bounds = array<i64: 1, 32>}, {pipeline_mode = #tpu.pipeline_mode<synchronous>, transform_indices = @transform_18, window_bounds = array<i64: 1, 32>}, {pipeline_mode = #tpu.pipeline_mode<synchronous>, transform_indices = @transform_19, window_bounds = array<i64: 32, 64>}, {pipeline_mode = #tpu.pipeline_mode<synchronous>, transform_indices = @transform_20, window_bounds = array<i64: 1, 64>}, {pipeline_mode = #tpu.pipeline_mode<synchronous>, transform_indices = @transform_21, window_bounds = array<i64: 64, 32>}, {pipeline_mode = #tpu.pipeline_mode<synchronous>, transform_indices = @transform_22, window_bounds = array<i64: 1, 32>}, {pipeline_mode = #tpu.pipeline_mode<synchronous>, transform_indices = @transform_23, window_bounds = array<i64: 1, 32>}, {pipeline_mode = #tpu.pipeline_mode<synchronous>, transform_indices = @transform_24, window_bounds = array<i64: 1, 32>}, {transform_indices = @transform_25, window_bounds = array<i64: 1, 8, 128>}]} {
    %c0 = arith.constant 0 : index
    %c0_0 = arith.constant 0 : index
    %c0_1 = arith.constant 0 : index
    %0 = vector.load %arg1[%c0, %c0_0, %c0_1] : memref<1x8x32xf32, #tpu.memory_space<vmem>>, vector<1x8x32xf32>
    %1 = vector.shape_cast %0 : vector<1x8x32xf32> to vector<8x32xf32>
    %c0_2 = arith.constant 0 : index
    %c0_3 = arith.constant 0 : index
    %c0_4 = arith.constant 0 : index
    %2 = vector.load %arg2[%c0_2, %c0_3, %c0_4] : memref<1x10x32xf32, #tpu.memory_space<vmem>>, vector<1x10x32xf32>
    %3 = vector.shape_cast %2 : vector<1x10x32xf32> to vector<10x32xf32>
    %c0_5 = arith.constant 0 : index
    %c0_6 = arith.constant 0 : index
    %c0_7 = arith.constant 0 : index
    %4 = vector.load %arg3[%c0_5, %c0_6, %c0_7] : memref<1x8x1xf32, #tpu.memory_space<vmem>>, vector<1x8x1xf32>
    %5 = vector.shape_cast %4 : vector<1x8x1xf32> to vector<8x1xf32>
    %c0_8 = arith.constant 0 : index
    %c0_9 = arith.constant 0 : index
    %c0_10 = arith.constant 0 : index
    %6 = vector.load %arg4[%c0_8, %c0_9, %c0_10] : memref<1x8x8xf32, #tpu.memory_space<vmem>>, vector<1x8x8xf32>
    %7 = vector.shape_cast %6 : vector<1x8x8xf32> to vector<8x8xf32>
    %c0_11 = arith.constant 0 : index
    %c0_12 = arith.constant 0 : index
    %c0_13 = arith.constant 0 : index
    %8 = vector.load %arg5[%c0_11, %c0_12, %c0_13] : memref<1x8x10xf32, #tpu.memory_space<vmem>>, vector<1x8x10xf32>
    %9 = vector.shape_cast %8 : vector<1x8x10xf32> to vector<8x10xf32>
    %c0_14 = arith.constant 0 : index
    %c0_15 = arith.constant 0 : index
    %10 = vector.load %arg6[%c0_14, %c0_15] : memref<32x96xbf16, #tpu.memory_space<vmem>>, vector<32x96xbf16>
    %c0_16 = arith.constant 0 : index
    %c0_17 = arith.constant 0 : index
    %11 = vector.load %arg7[%c0_16, %c0_17] : memref<1x96xf32, #tpu.memory_space<vmem>>, vector<1x96xf32>
    %12 = arith.truncf %1 : vector<8x32xf32> to vector<8x32xbf16>
    %cst = arith.constant dense<0.000000e+00> : vector<8x96xf32>
    %13 = tpu.matmul %12, %10, %cst {dimension_numbers = #tpu.dot_dimension_numbers<[1], [0], [0], [1], [0, 0, 1, 1], [], []>} : vector<8x32xbf16>, vector<32x96xbf16>, vector<8x96xf32> -> vector<8x96xf32>
    %14 = vector.broadcast %11 : vector<1x96xf32> to vector<8x96xf32>
    %15 = arith.addf %13, %14 : vector<8x96xf32>
    %16 = vector.extract_strided_slice %15 {offsets = [0, 0], sizes = [8, 32], strides = [1, 1]} : vector<8x96xf32> to vector<8x32xf32>
    %17 = vector.extract_strided_slice %15 {offsets = [0, 32], sizes = [8, 32], strides = [1, 1]} : vector<8x96xf32> to vector<8x32xf32>
    %18 = vector.extract_strided_slice %15 {offsets = [0, 64], sizes = [8, 32], strides = [1, 1]} : vector<8x96xf32> to vector<8x32xf32>
    %19 = vector.extract_strided_slice %16 {offsets = [0, 0], sizes = [8, 8], strides = [1, 1]} : vector<8x32xf32> to vector<8x8xf32>
    %20 = arith.truncf %19 : vector<8x8xf32> to vector<8x8xbf16>
    %21 = vector.extract_strided_slice %17 {offsets = [0, 0], sizes = [8, 8], strides = [1, 1]} : vector<8x32xf32> to vector<8x8xf32>
    %22 = arith.truncf %21 : vector<8x8xf32> to vector<8x8xbf16>
    %23 = vector.extract_strided_slice %18 {offsets = [0, 0], sizes = [8, 8], strides = [1, 1]} : vector<8x32xf32> to vector<8x8xf32>
    %24 = arith.truncf %23 : vector<8x8xf32> to vector<8x8xbf16>
    %cst_18 = arith.constant dense<0.000000e+00> : vector<8x8xf32>
    %25 = tpu.matmul %20, %22, %cst_18 {dimension_numbers = #tpu.dot_dimension_numbers<[1], [1], [0], [0], [0, 0, 1, 0], [], []>} : vector<8x8xbf16>, vector<8x8xbf16>, vector<8x8xf32> -> vector<8x8xf32>
    %cst_19 = arith.constant 0.353553385 : f32
    %26 = vector.broadcast %cst_19 : f32 to vector<8x8xf32>
    %27 = arith.mulf %25, %26 : vector<8x8xf32>
    %28 = arith.addf %27, %7 : vector<8x8xf32>
    %cst_20 = arith.constant dense<0xFF800000> : vector<8xf32>
    %29 = vector.multi_reduction <maximumf>, %28, %cst_20 [1] : vector<8x8xf32> to vector<8xf32>
    %30 = vector.shape_cast %29 : vector<8xf32> to vector<8x1xf32>
    %31 = vector.broadcast %30 : vector<8x1xf32> to vector<8x8xf32>
    %32 = arith.subf %28, %31 : vector<8x8xf32>
    %33 = math.exp %32 : vector<8x8xf32>
    %cst_21 = arith.constant dense<0.000000e+00> : vector<8xf32>
    %34 = vector.multi_reduction <add>, %33, %cst_21 [1] : vector<8x8xf32> to vector<8xf32>
    %35 = vector.shape_cast %34 : vector<8xf32> to vector<8x1xf32>
    %36 = vector.broadcast %35 : vector<8x1xf32> to vector<8x8xf32>
    %37 = arith.divf %33, %36 : vector<8x8xf32>
    %38 = arith.truncf %37 : vector<8x8xf32> to vector<8x8xbf16>
    %cst_22 = arith.constant dense<0.000000e+00> : vector<8x8xf32>
    %39 = tpu.matmul %38, %24, %cst_22 {dimension_numbers = #tpu.dot_dimension_numbers<[1], [0], [0], [1], [0, 0, 1, 1], [], []>} : vector<8x8xbf16>, vector<8x8xbf16>, vector<8x8xf32> -> vector<8x8xf32>
    %40 = vector.extract_strided_slice %16 {offsets = [0, 8], sizes = [8, 8], strides = [1, 1]} : vector<8x32xf32> to vector<8x8xf32>
    %41 = arith.truncf %40 : vector<8x8xf32> to vector<8x8xbf16>
    %42 = vector.extract_strided_slice %17 {offsets = [0, 8], sizes = [8, 8], strides = [1, 1]} : vector<8x32xf32> to vector<8x8xf32>
    %43 = arith.truncf %42 : vector<8x8xf32> to vector<8x8xbf16>
    %44 = vector.extract_strided_slice %18 {offsets = [0, 8], sizes = [8, 8], strides = [1, 1]} : vector<8x32xf32> to vector<8x8xf32>
    %45 = arith.truncf %44 : vector<8x8xf32> to vector<8x8xbf16>
    %cst_23 = arith.constant dense<0.000000e+00> : vector<8x8xf32>
    %46 = tpu.matmul %41, %43, %cst_23 {dimension_numbers = #tpu.dot_dimension_numbers<[1], [1], [0], [0], [0, 0, 1, 0], [], []>} : vector<8x8xbf16>, vector<8x8xbf16>, vector<8x8xf32> -> vector<8x8xf32>
    %cst_24 = arith.constant 0.353553385 : f32
    %47 = vector.broadcast %cst_24 : f32 to vector<8x8xf32>
    %48 = arith.mulf %46, %47 : vector<8x8xf32>
    %49 = arith.addf %48, %7 : vector<8x8xf32>
    %cst_25 = arith.constant dense<0xFF800000> : vector<8xf32>
    %50 = vector.multi_reduction <maximumf>, %49, %cst_25 [1] : vector<8x8xf32> to vector<8xf32>
    %51 = vector.shape_cast %50 : vector<8xf32> to vector<8x1xf32>
    %52 = vector.broadcast %51 : vector<8x1xf32> to vector<8x8xf32>
    %53 = arith.subf %49, %52 : vector<8x8xf32>
    %54 = math.exp %53 : vector<8x8xf32>
    %cst_26 = arith.constant dense<0.000000e+00> : vector<8xf32>
    %55 = vector.multi_reduction <add>, %54, %cst_26 [1] : vector<8x8xf32> to vector<8xf32>
    %56 = vector.shape_cast %55 : vector<8xf32> to vector<8x1xf32>
    %57 = vector.broadcast %56 : vector<8x1xf32> to vector<8x8xf32>
    %58 = arith.divf %54, %57 : vector<8x8xf32>
    %59 = arith.truncf %58 : vector<8x8xf32> to vector<8x8xbf16>
    %cst_27 = arith.constant dense<0.000000e+00> : vector<8x8xf32>
    %60 = tpu.matmul %59, %45, %cst_27 {dimension_numbers = #tpu.dot_dimension_numbers<[1], [0], [0], [1], [0, 0, 1, 1], [], []>} : vector<8x8xbf16>, vector<8x8xbf16>, vector<8x8xf32> -> vector<8x8xf32>
    %61 = vector.extract_strided_slice %16 {offsets = [0, 16], sizes = [8, 8], strides = [1, 1]} : vector<8x32xf32> to vector<8x8xf32>
    %62 = arith.truncf %61 : vector<8x8xf32> to vector<8x8xbf16>
    %63 = vector.extract_strided_slice %17 {offsets = [0, 16], sizes = [8, 8], strides = [1, 1]} : vector<8x32xf32> to vector<8x8xf32>
    %64 = arith.truncf %63 : vector<8x8xf32> to vector<8x8xbf16>
    %65 = vector.extract_strided_slice %18 {offsets = [0, 16], sizes = [8, 8], strides = [1, 1]} : vector<8x32xf32> to vector<8x8xf32>
    %66 = arith.truncf %65 : vector<8x8xf32> to vector<8x8xbf16>
    %cst_28 = arith.constant dense<0.000000e+00> : vector<8x8xf32>
    %67 = tpu.matmul %62, %64, %cst_28 {dimension_numbers = #tpu.dot_dimension_numbers<[1], [1], [0], [0], [0, 0, 1, 0], [], []>} : vector<8x8xbf16>, vector<8x8xbf16>, vector<8x8xf32> -> vector<8x8xf32>
    %cst_29 = arith.constant 0.353553385 : f32
    %68 = vector.broadcast %cst_29 : f32 to vector<8x8xf32>
    %69 = arith.mulf %67, %68 : vector<8x8xf32>
    %70 = arith.addf %69, %7 : vector<8x8xf32>
    %cst_30 = arith.constant dense<0xFF800000> : vector<8xf32>
    %71 = vector.multi_reduction <maximumf>, %70, %cst_30 [1] : vector<8x8xf32> to vector<8xf32>
    %72 = vector.shape_cast %71 : vector<8xf32> to vector<8x1xf32>
    %73 = vector.broadcast %72 : vector<8x1xf32> to vector<8x8xf32>
    %74 = arith.subf %70, %73 : vector<8x8xf32>
    %75 = math.exp %74 : vector<8x8xf32>
    %cst_31 = arith.constant dense<0.000000e+00> : vector<8xf32>
    %76 = vector.multi_reduction <add>, %75, %cst_31 [1] : vector<8x8xf32> to vector<8xf32>
    %77 = vector.shape_cast %76 : vector<8xf32> to vector<8x1xf32>
    %78 = vector.broadcast %77 : vector<8x1xf32> to vector<8x8xf32>
    %79 = arith.divf %75, %78 : vector<8x8xf32>
    %80 = arith.truncf %79 : vector<8x8xf32> to vector<8x8xbf16>
    %cst_32 = arith.constant dense<0.000000e+00> : vector<8x8xf32>
    %81 = tpu.matmul %80, %66, %cst_32 {dimension_numbers = #tpu.dot_dimension_numbers<[1], [0], [0], [1], [0, 0, 1, 1], [], []>} : vector<8x8xbf16>, vector<8x8xbf16>, vector<8x8xf32> -> vector<8x8xf32>
    %82 = vector.extract_strided_slice %16 {offsets = [0, 24], sizes = [8, 8], strides = [1, 1]} : vector<8x32xf32> to vector<8x8xf32>
    %83 = arith.truncf %82 : vector<8x8xf32> to vector<8x8xbf16>
    %84 = vector.extract_strided_slice %17 {offsets = [0, 24], sizes = [8, 8], strides = [1, 1]} : vector<8x32xf32> to vector<8x8xf32>
    %85 = arith.truncf %84 : vector<8x8xf32> to vector<8x8xbf16>
    %86 = vector.extract_strided_slice %18 {offsets = [0, 24], sizes = [8, 8], strides = [1, 1]} : vector<8x32xf32> to vector<8x8xf32>
    %87 = arith.truncf %86 : vector<8x8xf32> to vector<8x8xbf16>
    %cst_33 = arith.constant dense<0.000000e+00> : vector<8x8xf32>
    %88 = tpu.matmul %83, %85, %cst_33 {dimension_numbers = #tpu.dot_dimension_numbers<[1], [1], [0], [0], [0, 0, 1, 0], [], []>} : vector<8x8xbf16>, vector<8x8xbf16>, vector<8x8xf32> -> vector<8x8xf32>
    %cst_34 = arith.constant 0.353553385 : f32
    %89 = vector.broadcast %cst_34 : f32 to vector<8x8xf32>
    %90 = arith.mulf %88, %89 : vector<8x8xf32>
    %91 = arith.addf %90, %7 : vector<8x8xf32>
    %cst_35 = arith.constant dense<0xFF800000> : vector<8xf32>
    %92 = vector.multi_reduction <maximumf>, %91, %cst_35 [1] : vector<8x8xf32> to vector<8xf32>
    %93 = vector.shape_cast %92 : vector<8xf32> to vector<8x1xf32>
    %94 = vector.broadcast %93 : vector<8x1xf32> to vector<8x8xf32>
    %95 = arith.subf %91, %94 : vector<8x8xf32>
    %96 = math.exp %95 : vector<8x8xf32>
    %cst_36 = arith.constant dense<0.000000e+00> : vector<8xf32>
    %97 = vector.multi_reduction <add>, %96, %cst_36 [1] : vector<8x8xf32> to vector<8xf32>
    %98 = vector.shape_cast %97 : vector<8xf32> to vector<8x1xf32>
    %99 = vector.broadcast %98 : vector<8x1xf32> to vector<8x8xf32>
    %100 = arith.divf %96, %99 : vector<8x8xf32>
    %101 = arith.truncf %100 : vector<8x8xf32> to vector<8x8xbf16>
    %cst_37 = arith.constant dense<0.000000e+00> : vector<8x8xf32>
    %102 = tpu.matmul %101, %87, %cst_37 {dimension_numbers = #tpu.dot_dimension_numbers<[1], [0], [0], [1], [0, 0, 1, 1], [], []>} : vector<8x8xbf16>, vector<8x8xbf16>, vector<8x8xf32> -> vector<8x8xf32>
    %103 = tpu.concatenate %39, %60, %81, %102 in 1 : vector<8x8xf32>, vector<8x8xf32>, vector<8x8xf32>, vector<8x8xf32> -> vector<8x32xf32>
    %c0_38 = arith.constant 0 : index
    %c0_39 = arith.constant 0 : index
    %104 = vector.load %arg8[%c0_38, %c0_39] : memref<32x32xbf16, #tpu.memory_space<vmem>>, vector<32x32xbf16>
    %c0_40 = arith.constant 0 : index
    %c0_41 = arith.constant 0 : index
    %105 = vector.load %arg9[%c0_40, %c0_41] : memref<1x32xf32, #tpu.memory_space<vmem>>, vector<1x32xf32>
    %c0_42 = arith.constant 0 : index
    %c0_43 = arith.constant 0 : index
    %106 = vector.load %arg10[%c0_42, %c0_43] : memref<1x32xf32, #tpu.memory_space<vmem>>, vector<1x32xf32>
    %c0_44 = arith.constant 0 : index
    %c0_45 = arith.constant 0 : index
    %107 = vector.load %arg11[%c0_44, %c0_45] : memref<1x32xf32, #tpu.memory_space<vmem>>, vector<1x32xf32>
    %108 = arith.truncf %103 : vector<8x32xf32> to vector<8x32xbf16>
    %cst_46 = arith.constant dense<0.000000e+00> : vector<8x32xf32>
    %109 = tpu.matmul %108, %104, %cst_46 {dimension_numbers = #tpu.dot_dimension_numbers<[1], [0], [0], [1], [0, 0, 1, 1], [], []>} : vector<8x32xbf16>, vector<32x32xbf16>, vector<8x32xf32> -> vector<8x32xf32>
    %110 = vector.broadcast %105 : vector<1x32xf32> to vector<8x32xf32>
    %111 = arith.addf %109, %110 : vector<8x32xf32>
    %112 = arith.addf %111, %1 : vector<8x32xf32>
    %cst_47 = arith.constant dense<0.000000e+00> : vector<8xf32>
    %113 = vector.multi_reduction <add>, %112, %cst_47 [1] : vector<8x32xf32> to vector<8xf32>
    %114 = vector.shape_cast %113 : vector<8xf32> to vector<8x1xf32>
    %cst_48 = arith.constant 3.200000e+01 : f32
    %115 = vector.broadcast %cst_48 : f32 to vector<8x1xf32>
    %116 = arith.divf %114, %115 : vector<8x1xf32>
    %117 = vector.broadcast %116 : vector<8x1xf32> to vector<8x32xf32>
    %118 = arith.subf %112, %117 : vector<8x32xf32>
    %119 = arith.mulf %118, %118 : vector<8x32xf32>
    %cst_49 = arith.constant dense<0.000000e+00> : vector<8xf32>
    %120 = vector.multi_reduction <add>, %119, %cst_49 [1] : vector<8x32xf32> to vector<8xf32>
    %121 = vector.shape_cast %120 : vector<8xf32> to vector<8x1xf32>
    %cst_50 = arith.constant 3.200000e+01 : f32
    %122 = vector.broadcast %cst_50 : f32 to vector<8x1xf32>
    %123 = arith.divf %121, %122 : vector<8x1xf32>
    %cst_51 = arith.constant 9.99999974E-6 : f32
    %124 = vector.broadcast %cst_51 : f32 to vector<8x1xf32>
    %125 = arith.addf %123, %124 : vector<8x1xf32>
    %126 = math.rsqrt %125 : vector<8x1xf32>
    %127 = vector.broadcast %126 : vector<8x1xf32> to vector<8x32xf32>
    %128 = arith.mulf %118, %127 : vector<8x32xf32>
    %129 = vector.broadcast %106 : vector<1x32xf32> to vector<8x32xf32>
    %130 = arith.mulf %128, %129 : vector<8x32xf32>
    %131 = vector.broadcast %107 : vector<1x32xf32> to vector<8x32xf32>
    %132 = arith.addf %130, %131 : vector<8x32xf32>
    %133 = vector.broadcast %5 : vector<8x1xf32> to vector<8x32xf32>
    %134 = arith.mulf %132, %133 : vector<8x32xf32>
    %c0_52 = arith.constant 0 : index
    %c0_53 = arith.constant 0 : index
    %135 = vector.load %arg12[%c0_52, %c0_53] : memref<32x32xbf16, #tpu.memory_space<vmem>>, vector<32x32xbf16>
    %c0_54 = arith.constant 0 : index
    %c0_55 = arith.constant 0 : index
    %136 = vector.load %arg13[%c0_54, %c0_55] : memref<1x32xf32, #tpu.memory_space<vmem>>, vector<1x32xf32>
    %137 = arith.truncf %134 : vector<8x32xf32> to vector<8x32xbf16>
    %cst_56 = arith.constant dense<0.000000e+00> : vector<8x32xf32>
    %138 = tpu.matmul %137, %135, %cst_56 {dimension_numbers = #tpu.dot_dimension_numbers<[1], [0], [0], [1], [0, 0, 1, 1], [], []>} : vector<8x32xbf16>, vector<32x32xbf16>, vector<8x32xf32> -> vector<8x32xf32>
    %139 = vector.broadcast %136 : vector<1x32xf32> to vector<8x32xf32>
    %140 = arith.addf %138, %139 : vector<8x32xf32>
    %c0_57 = arith.constant 0 : index
    %c0_58 = arith.constant 0 : index
    %141 = vector.load %arg14[%c0_57, %c0_58] : memref<32x64xbf16, #tpu.memory_space<vmem>>, vector<32x64xbf16>
    %c0_59 = arith.constant 0 : index
    %c0_60 = arith.constant 0 : index
    %142 = vector.load %arg15[%c0_59, %c0_60] : memref<1x64xf32, #tpu.memory_space<vmem>>, vector<1x64xf32>
    %143 = arith.truncf %3 : vector<10x32xf32> to vector<10x32xbf16>
    %cst_61 = arith.constant dense<0.000000e+00> : vector<10x64xf32>
    %144 = tpu.matmul %143, %141, %cst_61 {dimension_numbers = #tpu.dot_dimension_numbers<[1], [0], [0], [1], [0, 0, 1, 1], [], []>} : vector<10x32xbf16>, vector<32x64xbf16>, vector<10x64xf32> -> vector<10x64xf32>
    %145 = vector.broadcast %142 : vector<1x64xf32> to vector<10x64xf32>
    %146 = arith.addf %144, %145 : vector<10x64xf32>
    %147 = vector.extract_strided_slice %146 {offsets = [0, 0], sizes = [10, 32], strides = [1, 1]} : vector<10x64xf32> to vector<10x32xf32>
    %148 = vector.extract_strided_slice %146 {offsets = [0, 32], sizes = [10, 32], strides = [1, 1]} : vector<10x64xf32> to vector<10x32xf32>
    %149 = vector.extract_strided_slice %140 {offsets = [0, 0], sizes = [8, 8], strides = [1, 1]} : vector<8x32xf32> to vector<8x8xf32>
    %150 = arith.truncf %149 : vector<8x8xf32> to vector<8x8xbf16>
    %151 = vector.extract_strided_slice %147 {offsets = [0, 0], sizes = [10, 8], strides = [1, 1]} : vector<10x32xf32> to vector<10x8xf32>
    %152 = arith.truncf %151 : vector<10x8xf32> to vector<10x8xbf16>
    %153 = vector.extract_strided_slice %148 {offsets = [0, 0], sizes = [10, 8], strides = [1, 1]} : vector<10x32xf32> to vector<10x8xf32>
    %154 = arith.truncf %153 : vector<10x8xf32> to vector<10x8xbf16>
    %cst_62 = arith.constant dense<0.000000e+00> : vector<8x10xf32>
    %155 = tpu.matmul %150, %152, %cst_62 {dimension_numbers = #tpu.dot_dimension_numbers<[1], [1], [0], [0], [0, 0, 1, 0], [], []>} : vector<8x8xbf16>, vector<10x8xbf16>, vector<8x10xf32> -> vector<8x10xf32>
    %cst_63 = arith.constant 0.353553385 : f32
    %156 = vector.broadcast %cst_63 : f32 to vector<8x10xf32>
    %157 = arith.mulf %155, %156 : vector<8x10xf32>
    %158 = arith.addf %157, %9 : vector<8x10xf32>
    %cst_64 = arith.constant dense<0xFF800000> : vector<8xf32>
    %159 = vector.multi_reduction <maximumf>, %158, %cst_64 [1] : vector<8x10xf32> to vector<8xf32>
    %160 = vector.shape_cast %159 : vector<8xf32> to vector<8x1xf32>
    %161 = vector.broadcast %160 : vector<8x1xf32> to vector<8x10xf32>
    %162 = arith.subf %158, %161 : vector<8x10xf32>
    %163 = math.exp %162 : vector<8x10xf32>
    %cst_65 = arith.constant dense<0.000000e+00> : vector<8xf32>
    %164 = vector.multi_reduction <add>, %163, %cst_65 [1] : vector<8x10xf32> to vector<8xf32>
    %165 = vector.shape_cast %164 : vector<8xf32> to vector<8x1xf32>
    %166 = vector.broadcast %165 : vector<8x1xf32> to vector<8x10xf32>
    %167 = arith.divf %163, %166 : vector<8x10xf32>
    %168 = arith.truncf %167 : vector<8x10xf32> to vector<8x10xbf16>
    %cst_66 = arith.constant dense<0.000000e+00> : vector<8x8xf32>
    %169 = tpu.matmul %168, %154, %cst_66 {dimension_numbers = #tpu.dot_dimension_numbers<[1], [0], [0], [1], [0, 0, 1, 1], [], []>} : vector<8x10xbf16>, vector<10x8xbf16>, vector<8x8xf32> -> vector<8x8xf32>
    %170 = vector.extract_strided_slice %140 {offsets = [0, 8], sizes = [8, 8], strides = [1, 1]} : vector<8x32xf32> to vector<8x8xf32>
    %171 = arith.truncf %170 : vector<8x8xf32> to vector<8x8xbf16>
    %172 = vector.extract_strided_slice %147 {offsets = [0, 8], sizes = [10, 8], strides = [1, 1]} : vector<10x32xf32> to vector<10x8xf32>
    %173 = arith.truncf %172 : vector<10x8xf32> to vector<10x8xbf16>
    %174 = vector.extract_strided_slice %148 {offsets = [0, 8], sizes = [10, 8], strides = [1, 1]} : vector<10x32xf32> to vector<10x8xf32>
    %175 = arith.truncf %174 : vector<10x8xf32> to vector<10x8xbf16>
    %cst_67 = arith.constant dense<0.000000e+00> : vector<8x10xf32>
    %176 = tpu.matmul %171, %173, %cst_67 {dimension_numbers = #tpu.dot_dimension_numbers<[1], [1], [0], [0], [0, 0, 1, 0], [], []>} : vector<8x8xbf16>, vector<10x8xbf16>, vector<8x10xf32> -> vector<8x10xf32>
    %cst_68 = arith.constant 0.353553385 : f32
    %177 = vector.broadcast %cst_68 : f32 to vector<8x10xf32>
    %178 = arith.mulf %176, %177 : vector<8x10xf32>
    %179 = arith.addf %178, %9 : vector<8x10xf32>
    %cst_69 = arith.constant dense<0xFF800000> : vector<8xf32>
    %180 = vector.multi_reduction <maximumf>, %179, %cst_69 [1] : vector<8x10xf32> to vector<8xf32>
    %181 = vector.shape_cast %180 : vector<8xf32> to vector<8x1xf32>
    %182 = vector.broadcast %181 : vector<8x1xf32> to vector<8x10xf32>
    %183 = arith.subf %179, %182 : vector<8x10xf32>
    %184 = math.exp %183 : vector<8x10xf32>
    %cst_70 = arith.constant dense<0.000000e+00> : vector<8xf32>
    %185 = vector.multi_reduction <add>, %184, %cst_70 [1] : vector<8x10xf32> to vector<8xf32>
    %186 = vector.shape_cast %185 : vector<8xf32> to vector<8x1xf32>
    %187 = vector.broadcast %186 : vector<8x1xf32> to vector<8x10xf32>
    %188 = arith.divf %184, %187 : vector<8x10xf32>
    %189 = arith.truncf %188 : vector<8x10xf32> to vector<8x10xbf16>
    %cst_71 = arith.constant dense<0.000000e+00> : vector<8x8xf32>
    %190 = tpu.matmul %189, %175, %cst_71 {dimension_numbers = #tpu.dot_dimension_numbers<[1], [0], [0], [1], [0, 0, 1, 1], [], []>} : vector<8x10xbf16>, vector<10x8xbf16>, vector<8x8xf32> -> vector<8x8xf32>
    %191 = vector.extract_strided_slice %140 {offsets = [0, 16], sizes = [8, 8], strides = [1, 1]} : vector<8x32xf32> to vector<8x8xf32>
    %192 = arith.truncf %191 : vector<8x8xf32> to vector<8x8xbf16>
    %193 = vector.extract_strided_slice %147 {offsets = [0, 16], sizes = [10, 8], strides = [1, 1]} : vector<10x32xf32> to vector<10x8xf32>
    %194 = arith.truncf %193 : vector<10x8xf32> to vector<10x8xbf16>
    %195 = vector.extract_strided_slice %148 {offsets = [0, 16], sizes = [10, 8], strides = [1, 1]} : vector<10x32xf32> to vector<10x8xf32>
    %196 = arith.truncf %195 : vector<10x8xf32> to vector<10x8xbf16>
    %cst_72 = arith.constant dense<0.000000e+00> : vector<8x10xf32>
    %197 = tpu.matmul %192, %194, %cst_72 {dimension_numbers = #tpu.dot_dimension_numbers<[1], [1], [0], [0], [0, 0, 1, 0], [], []>} : vector<8x8xbf16>, vector<10x8xbf16>, vector<8x10xf32> -> vector<8x10xf32>
    %cst_73 = arith.constant 0.353553385 : f32
    %198 = vector.broadcast %cst_73 : f32 to vector<8x10xf32>
    %199 = arith.mulf %197, %198 : vector<8x10xf32>
    %200 = arith.addf %199, %9 : vector<8x10xf32>
    %cst_74 = arith.constant dense<0xFF800000> : vector<8xf32>
    %201 = vector.multi_reduction <maximumf>, %200, %cst_74 [1] : vector<8x10xf32> to vector<8xf32>
    %202 = vector.shape_cast %201 : vector<8xf32> to vector<8x1xf32>
    %203 = vector.broadcast %202 : vector<8x1xf32> to vector<8x10xf32>
    %204 = arith.subf %200, %203 : vector<8x10xf32>
    %205 = math.exp %204 : vector<8x10xf32>
    %cst_75 = arith.constant dense<0.000000e+00> : vector<8xf32>
    %206 = vector.multi_reduction <add>, %205, %cst_75 [1] : vector<8x10xf32> to vector<8xf32>
    %207 = vector.shape_cast %206 : vector<8xf32> to vector<8x1xf32>
    %208 = vector.broadcast %207 : vector<8x1xf32> to vector<8x10xf32>
    %209 = arith.divf %205, %208 : vector<8x10xf32>
    %210 = arith.truncf %209 : vector<8x10xf32> to vector<8x10xbf16>
    %cst_76 = arith.constant dense<0.000000e+00> : vector<8x8xf32>
    %211 = tpu.matmul %210, %196, %cst_76 {dimension_numbers = #tpu.dot_dimension_numbers<[1], [0], [0], [1], [0, 0, 1, 1], [], []>} : vector<8x10xbf16>, vector<10x8xbf16>, vector<8x8xf32> -> vector<8x8xf32>
    %212 = vector.extract_strided_slice %140 {offsets = [0, 24], sizes = [8, 8], strides = [1, 1]} : vector<8x32xf32> to vector<8x8xf32>
    %213 = arith.truncf %212 : vector<8x8xf32> to vector<8x8xbf16>
    %214 = vector.extract_strided_slice %147 {offsets = [0, 24], sizes = [10, 8], strides = [1, 1]} : vector<10x32xf32> to vector<10x8xf32>
    %215 = arith.truncf %214 : vector<10x8xf32> to vector<10x8xbf16>
    %216 = vector.extract_strided_slice %148 {offsets = [0, 24], sizes = [10, 8], strides = [1, 1]} : vector<10x32xf32> to vector<10x8xf32>
    %217 = arith.truncf %216 : vector<10x8xf32> to vector<10x8xbf16>
    %cst_77 = arith.constant dense<0.000000e+00> : vector<8x10xf32>
    %218 = tpu.matmul %213, %215, %cst_77 {dimension_numbers = #tpu.dot_dimension_numbers<[1], [1], [0], [0], [0, 0, 1, 0], [], []>} : vector<8x8xbf16>, vector<10x8xbf16>, vector<8x10xf32> -> vector<8x10xf32>
    %cst_78 = arith.constant 0.353553385 : f32
    %219 = vector.broadcast %cst_78 : f32 to vector<8x10xf32>
    %220 = arith.mulf %218, %219 : vector<8x10xf32>
    %221 = arith.addf %220, %9 : vector<8x10xf32>
    %cst_79 = arith.constant dense<0xFF800000> : vector<8xf32>
    %222 = vector.multi_reduction <maximumf>, %221, %cst_79 [1] : vector<8x10xf32> to vector<8xf32>
    %223 = vector.shape_cast %222 : vector<8xf32> to vector<8x1xf32>
    %224 = vector.broadcast %223 : vector<8x1xf32> to vector<8x10xf32>
    %225 = arith.subf %221, %224 : vector<8x10xf32>
    %226 = math.exp %225 : vector<8x10xf32>
    %cst_80 = arith.constant dense<0.000000e+00> : vector<8xf32>
    %227 = vector.multi_reduction <add>, %226, %cst_80 [1] : vector<8x10xf32> to vector<8xf32>
    %228 = vector.shape_cast %227 : vector<8xf32> to vector<8x1xf32>
    %229 = vector.broadcast %228 : vector<8x1xf32> to vector<8x10xf32>
    %230 = arith.divf %226, %229 : vector<8x10xf32>
    %231 = arith.truncf %230 : vector<8x10xf32> to vector<8x10xbf16>
    %cst_81 = arith.constant dense<0.000000e+00> : vector<8x8xf32>
    %232 = tpu.matmul %231, %217, %cst_81 {dimension_numbers = #tpu.dot_dimension_numbers<[1], [0], [0], [1], [0, 0, 1, 1], [], []>} : vector<8x10xbf16>, vector<10x8xbf16>, vector<8x8xf32> -> vector<8x8xf32>
    %233 = tpu.concatenate %169, %190, %211, %232 in 1 : vector<8x8xf32>, vector<8x8xf32>, vector<8x8xf32>, vector<8x8xf32> -> vector<8x32xf32>
    %c0_82 = arith.constant 0 : index
    %c0_83 = arith.constant 0 : index
    %234 = vector.load %arg16[%c0_82, %c0_83] : memref<32x32xbf16, #tpu.memory_space<vmem>>, vector<32x32xbf16>
    %c0_84 = arith.constant 0 : index
    %c0_85 = arith.constant 0 : index
    %235 = vector.load %arg17[%c0_84, %c0_85] : memref<1x32xf32, #tpu.memory_space<vmem>>, vector<1x32xf32>
    %c0_86 = arith.constant 0 : index
    %c0_87 = arith.constant 0 : index
    %236 = vector.load %arg18[%c0_86, %c0_87] : memref<1x32xf32, #tpu.memory_space<vmem>>, vector<1x32xf32>
    %c0_88 = arith.constant 0 : index
    %c0_89 = arith.constant 0 : index
    %237 = vector.load %arg19[%c0_88, %c0_89] : memref<1x32xf32, #tpu.memory_space<vmem>>, vector<1x32xf32>
    %238 = arith.truncf %233 : vector<8x32xf32> to vector<8x32xbf16>
    %cst_90 = arith.constant dense<0.000000e+00> : vector<8x32xf32>
    %239 = tpu.matmul %238, %234, %cst_90 {dimension_numbers = #tpu.dot_dimension_numbers<[1], [0], [0], [1], [0, 0, 1, 1], [], []>} : vector<8x32xbf16>, vector<32x32xbf16>, vector<8x32xf32> -> vector<8x32xf32>
    %240 = vector.broadcast %235 : vector<1x32xf32> to vector<8x32xf32>
    %241 = arith.addf %239, %240 : vector<8x32xf32>
    %242 = arith.addf %241, %134 : vector<8x32xf32>
    %cst_91 = arith.constant dense<0.000000e+00> : vector<8xf32>
    %243 = vector.multi_reduction <add>, %242, %cst_91 [1] : vector<8x32xf32> to vector<8xf32>
    %244 = vector.shape_cast %243 : vector<8xf32> to vector<8x1xf32>
    %cst_92 = arith.constant 3.200000e+01 : f32
    %245 = vector.broadcast %cst_92 : f32 to vector<8x1xf32>
    %246 = arith.divf %244, %245 : vector<8x1xf32>
    %247 = vector.broadcast %246 : vector<8x1xf32> to vector<8x32xf32>
    %248 = arith.subf %242, %247 : vector<8x32xf32>
    %249 = arith.mulf %248, %248 : vector<8x32xf32>
    %cst_93 = arith.constant dense<0.000000e+00> : vector<8xf32>
    %250 = vector.multi_reduction <add>, %249, %cst_93 [1] : vector<8x32xf32> to vector<8xf32>
    %251 = vector.shape_cast %250 : vector<8xf32> to vector<8x1xf32>
    %cst_94 = arith.constant 3.200000e+01 : f32
    %252 = vector.broadcast %cst_94 : f32 to vector<8x1xf32>
    %253 = arith.divf %251, %252 : vector<8x1xf32>
    %cst_95 = arith.constant 9.99999974E-6 : f32
    %254 = vector.broadcast %cst_95 : f32 to vector<8x1xf32>
    %255 = arith.addf %253, %254 : vector<8x1xf32>
    %256 = math.rsqrt %255 : vector<8x1xf32>
    %257 = vector.broadcast %256 : vector<8x1xf32> to vector<8x32xf32>
    %258 = arith.mulf %248, %257 : vector<8x32xf32>
    %259 = vector.broadcast %236 : vector<1x32xf32> to vector<8x32xf32>
    %260 = arith.mulf %258, %259 : vector<8x32xf32>
    %261 = vector.broadcast %237 : vector<1x32xf32> to vector<8x32xf32>
    %262 = arith.addf %260, %261 : vector<8x32xf32>
    %263 = vector.broadcast %5 : vector<8x1xf32> to vector<8x32xf32>
    %264 = arith.mulf %262, %263 : vector<8x32xf32>
    %c0_96 = arith.constant 0 : index
    %c0_97 = arith.constant 0 : index
    %265 = vector.load %arg20[%c0_96, %c0_97] : memref<32x64xbf16, #tpu.memory_space<vmem>>, vector<32x64xbf16>
    %c0_98 = arith.constant 0 : index
    %c0_99 = arith.constant 0 : index
    %266 = vector.load %arg21[%c0_98, %c0_99] : memref<1x64xf32, #tpu.memory_space<vmem>>, vector<1x64xf32>
    %267 = arith.truncf %264 : vector<8x32xf32> to vector<8x32xbf16>
    %cst_100 = arith.constant dense<0.000000e+00> : vector<8x64xf32>
    %268 = tpu.matmul %267, %265, %cst_100 {dimension_numbers = #tpu.dot_dimension_numbers<[1], [0], [0], [1], [0, 0, 1, 1], [], []>} : vector<8x32xbf16>, vector<32x64xbf16>, vector<8x64xf32> -> vector<8x64xf32>
    %269 = vector.broadcast %266 : vector<1x64xf32> to vector<8x64xf32>
    %270 = arith.addf %268, %269 : vector<8x64xf32>
    %cst_101 = arith.constant 0.000000e+00 : f32
    %271 = vector.broadcast %cst_101 : f32 to vector<8x64xf32>
    %272 = arith.maximumf %270, %271 : vector<8x64xf32>
    %c0_102 = arith.constant 0 : index
    %c0_103 = arith.constant 0 : index
    %273 = vector.load %arg22[%c0_102, %c0_103] : memref<64x32xbf16, #tpu.memory_space<vmem>>, vector<64x32xbf16>
    %c0_104 = arith.constant 0 : index
    %c0_105 = arith.constant 0 : index
    %274 = vector.load %arg23[%c0_104, %c0_105] : memref<1x32xf32, #tpu.memory_space<vmem>>, vector<1x32xf32>
    %275 = arith.truncf %272 : vector<8x64xf32> to vector<8x64xbf16>
    %cst_106 = arith.constant dense<0.000000e+00> : vector<8x32xf32>
    %276 = tpu.matmul %275, %273, %cst_106 {dimension_numbers = #tpu.dot_dimension_numbers<[1], [0], [0], [1], [0, 0, 1, 1], [], []>} : vector<8x64xbf16>, vector<64x32xbf16>, vector<8x32xf32> -> vector<8x32xf32>
    %277 = vector.broadcast %274 : vector<1x32xf32> to vector<8x32xf32>
    %278 = arith.addf %276, %277 : vector<8x32xf32>
    %279 = arith.addf %278, %264 : vector<8x32xf32>
    %c0_107 = arith.constant 0 : index
    %c0_108 = arith.constant 0 : index
    %280 = vector.load %arg24[%c0_107, %c0_108] : memref<1x32xf32, #tpu.memory_space<vmem>>, vector<1x32xf32>
    %c0_109 = arith.constant 0 : index
    %c0_110 = arith.constant 0 : index
    %281 = vector.load %arg25[%c0_109, %c0_110] : memref<1x32xf32, #tpu.memory_space<vmem>>, vector<1x32xf32>
    %cst_111 = arith.constant dense<0.000000e+00> : vector<8xf32>
    %282 = vector.multi_reduction <add>, %279, %cst_111 [1] : vector<8x32xf32> to vector<8xf32>
    %283 = vector.shape_cast %282 : vector<8xf32> to vector<8x1xf32>
    %cst_112 = arith.constant 3.200000e+01 : f32
    %284 = vector.broadcast %cst_112 : f32 to vector<8x1xf32>
    %285 = arith.divf %283, %284 : vector<8x1xf32>
    %286 = vector.broadcast %285 : vector<8x1xf32> to vector<8x32xf32>
    %287 = arith.subf %279, %286 : vector<8x32xf32>
    %288 = arith.mulf %287, %287 : vector<8x32xf32>
    %cst_113 = arith.constant dense<0.000000e+00> : vector<8xf32>
    %289 = vector.multi_reduction <add>, %288, %cst_113 [1] : vector<8x32xf32> to vector<8xf32>
    %290 = vector.shape_cast %289 : vector<8xf32> to vector<8x1xf32>
    %cst_114 = arith.constant 3.200000e+01 : f32
    %291 = vector.broadcast %cst_114 : f32 to vector<8x1xf32>
    %292 = arith.divf %290, %291 : vector<8x1xf32>
    %cst_115 = arith.constant 9.99999974E-6 : f32
    %293 = vector.broadcast %cst_115 : f32 to vector<8x1xf32>
    %294 = arith.addf %292, %293 : vector<8x1xf32>
    %295 = math.rsqrt %294 : vector<8x1xf32>
    %296 = vector.broadcast %295 : vector<8x1xf32> to vector<8x32xf32>
    %297 = arith.mulf %287, %296 : vector<8x32xf32>
    %298 = vector.broadcast %280 : vector<1x32xf32> to vector<8x32xf32>
    %299 = arith.mulf %297, %298 : vector<8x32xf32>
    %300 = vector.broadcast %281 : vector<1x32xf32> to vector<8x32xf32>
    %301 = arith.addf %299, %300 : vector<8x32xf32>
    %302 = vector.broadcast %5 : vector<8x1xf32> to vector<8x32xf32>
    %303 = arith.mulf %301, %302 : vector<8x32xf32>
    %cst_116 = arith.constant 0.000000e+00 : f32
    %304 = vector.broadcast %cst_116 : f32 to vector<8x96xf32>
    %305 = tpu.concatenate %303, %304 in 1 : vector<8x32xf32>, vector<8x96xf32> -> vector<8x128xf32>
    %c0_117 = arith.constant 0 : index
    %c0_118 = arith.constant 0 : index
    %c0_119 = arith.constant 0 : index
    %306 = vector.load %arg26[%c0_117, %c0_118, %c0_119] : memref<1x8x128xf32, #tpu.memory_space<vmem>>, vector<1x8x128xf32>
    %307 = vector.shape_cast %306 : vector<1x8x128xf32> to vector<8x128xf32>
    %308 = vector.shape_cast %305 : vector<8x128xf32> to vector<1x8x128xf32>
    tpu.vector_store %arg26[%c0_117, %c0_118, %c0_119], %308 {strides = array<i32>} : memref<1x8x128xf32, #tpu.memory_space<vmem>>, vector<1x8x128xf32>,
    return
  }
  func.func @transform_0(%arg0: i32) -> (i32, i32, i32) {
    %c0_i32 = arith.constant 0 : i32
    %c0_i32_0 = arith.constant 0 : i32
    %c0_i32_1 = arith.constant 0 : i32
    return %arg0, %c0_i32, %c0_i32_0 : i32, i32, i32
  }
  func.func @transform_1(%arg0: i32) -> (i32, i32, i32) {
    %c0_i32 = arith.constant 0 : i32
    %c0_i32_0 = arith.constant 0 : i32
    %c0_i32_1 = arith.constant 0 : i32
    return %arg0, %c0_i32, %c0_i32_0 : i32, i32, i32
  }
  func.func @transform_2(%arg0: i32) -> (i32, i32, i32) {
    %c0_i32 = arith.constant 0 : i32
    %c0_i32_0 = arith.constant 0 : i32
    %c0_i32_1 = arith.constant 0 : i32
    return %arg0, %c0_i32, %c0_i32_0 : i32, i32, i32
  }
  func.func @transform_3(%arg0: i32) -> (i32, i32, i32) {
    %c0_i32 = arith.constant 0 : i32
    %c0_i32_0 = arith.constant 0 : i32
    %c0_i32_1 = arith.constant 0 : i32
    return %arg0, %c0_i32, %c0_i32_0 : i32, i32, i32
  }
  func.func @transform_4(%arg0: i32) -> (i32, i32, i32) {
    %c0_i32 = arith.constant 0 : i32
    %c0_i32_0 = arith.constant 0 : i32
    %c0_i32_1 = arith.constant 0 : i32
    return %arg0, %c0_i32, %c0_i32_0 : i32, i32, i32
  }
  func.func @transform_5(%arg0: i32) -> (i32, i32) {
    %c0_i32 = arith.constant 0 : i32
    %c0_i32_0 = arith.constant 0 : i32
    %c0_i32_1 = arith.constant 0 : i32
    return %c0_i32, %c0_i32_0 : i32, i32
  }
  func.func @transform_6(%arg0: i32) -> (i32, i32) {
    %c0_i32 = arith.constant 0 : i32
    %c0_i32_0 = arith.constant 0 : i32
    %c0_i32_1 = arith.constant 0 : i32
    return %c0_i32, %c0_i32_0 : i32, i32
  }
  func.func @transform_7(%arg0: i32) -> (i32, i32) {
    %c0_i32 = arith.constant 0 : i32
    %c0_i32_0 = arith.constant 0 : i32
    %c0_i32_1 = arith.constant 0 : i32
    return %c0_i32, %c0_i32_0 : i32, i32
  }
  func.func @transform_8(%arg0: i32) -> (i32, i32) {
    %c0_i32 = arith.constant 0 : i32
    %c0_i32_0 = arith.constant 0 : i32
    %c0_i32_1 = arith.constant 0 : i32
    return %c0_i32, %c0_i32_0 : i32, i32
  }
  func.func @transform_9(%arg0: i32) -> (i32, i32) {
    %c0_i32 = arith.constant 0 : i32
    %c0_i32_0 = arith.constant 0 : i32
    %c0_i32_1 = arith.constant 0 : i32
    return %c0_i32, %c0_i32_0 : i32, i32
  }
  func.func @transform_10(%arg0: i32) -> (i32, i32) {
    %c0_i32 = arith.constant 0 : i32
    %c0_i32_0 = arith.constant 0 : i32
    %c0_i32_1 = arith.constant 0 : i32
    return %c0_i32, %c0_i32_0 : i32, i32
  }
  func.func @transform_11(%arg0: i32) -> (i32, i32) {
    %c0_i32 = arith.constant 0 : i32
    %c0_i32_0 = arith.constant 0 : i32
    %c0_i32_1 = arith.constant 0 : i32
    return %c0_i32, %c0_i32_0 : i32, i32
  }
  func.func @transform_12(%arg0: i32) -> (i32, i32) {
    %c0_i32 = arith.constant 0 : i32
    %c0_i32_0 = arith.constant 0 : i32
    %c0_i32_1 = arith.constant 0 : i32
    return %c0_i32, %c0_i32_0 : i32, i32
  }
  func.func @transform_13(%arg0: i32) -> (i32, i32) {
    %c0_i32 = arith.constant 0 : i32
    %c0_i32_0 = arith.constant 0 : i32
    %c0_i32_1 = arith.constant 0 : i32
    return %c0_i32, %c0_i32_0 : i32, i32
  }
  func.func @transform_14(%arg0: i32) -> (i32, i32) {
    %c0_i32 = arith.constant 0 : i32
    %c0_i32_0 = arith.constant 0 : i32
    %c0_i32_1 = arith.constant 0 : i32
    return %c0_i32, %c0_i32_0 : i32, i32
  }
  func.func @transform_15(%arg0: i32) -> (i32, i32) {
    %c0_i32 = arith.constant 0 : i32
    %c0_i32_0 = arith.constant 0 : i32
    %c0_i32_1 = arith.constant 0 : i32
    return %c0_i32, %c0_i32_0 : i32, i32
  }
  func.func @transform_16(%arg0: i32) -> (i32, i32) {
    %c0_i32 = arith.constant 0 : i32
    %c0_i32_0 = arith.constant 0 : i32
    %c0_i32_1 = arith.constant 0 : i32
    return %c0_i32, %c0_i32_0 : i32, i32
  }
  func.func @transform_17(%arg0: i32) -> (i32, i32) {
    %c0_i32 = arith.constant 0 : i32
    %c0_i32_0 = arith.constant 0 : i32
    %c0_i32_1 = arith.constant 0 : i32
    return %c0_i32, %c0_i32_0 : i32, i32
  }
  func.func @transform_18(%arg0: i32) -> (i32, i32) {
    %c0_i32 = arith.constant 0 : i32
    %c0_i32_0 = arith.constant 0 : i32
    %c0_i32_1 = arith.constant 0 : i32
    return %c0_i32, %c0_i32_0 : i32, i32
  }
  func.func @transform_19(%arg0: i32) -> (i32, i32) {
    %c0_i32 = arith.constant 0 : i32
    %c0_i32_0 = arith.constant 0 : i32
    %c0_i32_1 = arith.constant 0 : i32
    return %c0_i32, %c0_i32_0 : i32, i32
  }
  func.func @transform_20(%arg0: i32) -> (i32, i32) {
    %c0_i32 = arith.constant 0 : i32
    %c0_i32_0 = arith.constant 0 : i32
    %c0_i32_1 = arith.constant 0 : i32
    return %c0_i32, %c0_i32_0 : i32, i32
  }
  func.func @transform_21(%arg0: i32) -> (i32, i32) {
    %c0_i32 = arith.constant 0 : i32
    %c0_i32_0 = arith.constant 0 : i32
    %c0_i32_1 = arith.constant 0 : i32
    return %c0_i32, %c0_i32_0 : i32, i32
  }
  func.func @transform_22(%arg0: i32) -> (i32, i32) {
    %c0_i32 = arith.constant 0 : i32
    %c0_i32_0 = arith.constant 0 : i32
    %c0_i32_1 = arith.constant 0 : i32
    return %c0_i32, %c0_i32_0 : i32, i32
  }
  func.func @transform_23(%arg0: i32) -> (i32, i32) {
    %c0_i32 = arith.constant 0 : i32
    %c0_i32_0 = arith.constant 0 : i32
    %c0_i32_1 = arith.constant 0 : i32
    return %c0_i32, %c0_i32_0 : i32, i32
  }
  func.func @transform_24(%arg0: i32) -> (i32, i32) {
    %c0_i32 = arith.constant 0 : i32
    %c0_i32_0 = arith.constant 0 : i32
    %c0_i32_1 = arith.constant 0 : i32
    return %c0_i32, %c0_i32_0 : i32, i32
  }
  func.func @transform_25(%arg0: i32) -> (i32, i32, i32) {
    %c0_i32 = arith.constant 0 : i32
    %c0_i32_0 = arith.constant 0 : i32
    %c0_i32_1 = arith.constant 0 : i32
    return %arg0, %c0_i32, %c0_i32_0 : i32, i32, i32
  }
}

</mosaic_0001>

<bundles_post_ra>
// kernel: tpu_custom_call.1
= control target key start
LH: loop header
LB: loop body
LE: loop exit
PB: predicated region body
PF: predicated region fallthrough
CT: control target
= control target key end

     0   :  { %s3144_s0 = inlined_call_operand.vmem [shape: f32[2,8,32], index: 0, kind: input, shape index: {}]   ;;  %s3145_s1 = inlined_call_operand.vmem [shape: f32[2,10,32], index: 1, kind: input, shape index: {}]   ;;  %s3146_s2 = inlined_call_operand.vmem [shape: f32[2,8,1], index: 2, kind: input, shape index: {}]   ;;  %s3147_s3 = inlined_call_operand.vmem [shape: f32[2,8,8], index: 3, kind: input, shape index: {}]   ;;  %s3148_s4 = inlined_call_operand.vmem [shape: f32[2,8,10], index: 4, kind: input, shape index: {}]   ;;  %s3149_s5 = inlined_call_operand.vmem [shape: bf16[32,96], index: 5, kind: input, shape index: {}]   ;;  %s3150_s6 = inlined_call_operand.vmem [shape: f32[1,96], index: 6, kind: input, shape index: {}]   ;;  %s3151_s7 = inlined_call_operand.vmem [shape: bf16[32,32], index: 7, kind: input, shape index: {}]   ;;  %s3152_s8 = inlined_call_operand.hbm [shape: f32[1,32], index: 8, kind: input, shape index: {}]   ;;  %s3153_s9 = inlined_call_operand.hbm [shape: f32[1,32], index: 9, kind: input, shape index: {}]   ;;  %s3154_s10 = inlined_call_operand.hbm [shape: f32[1,32], index: 10, kind: input, shape index: {}]   ;;  %s3155_s11 = inlined_call_operand.vmem [shape: bf16[32,32], index: 11, kind: input, shape index: {}]   ;;  %s3156_s12 = inlined_call_operand.hbm [shape: f32[1,32], index: 12, kind: input, shape index: {}]   ;;  %s3157_s13 = inlined_call_operand.vmem [shape: bf16[32,64], index: 13, kind: input, shape index: {}]   ;;  %s3158_s14 = inlined_call_operand.vmem [shape: f32[1,64], index: 14, kind: input, shape index: {}]   ;;  %s3159_s15 = inlined_call_operand.vmem [shape: bf16[32,32], index: 15, kind: input, shape index: {}]   ;;  %s3160_s16 = inlined_call_operand.vmem [shape: f32[1,32], index: 16, kind: input, shape index: {}]   ;;  %s3161_s17 = inlined_call_operand.vmem [shape: f32[1,32], index: 17, kind: input, shape index: {}]   ;;  %s3162_s18 = inlined_call_operand.vmem [shape: f32[1,32], index: 18, kind: input, shape index: {}]   ;;  %s3163_s19 = inlined_call_operand.hbm [shape: bf16[32,64], index: 19, kind: input, shape index: {}]   ;;  %s3164_s20 = inlined_call_operand.vmem [shape: f32[1,64], index: 20, kind: input, shape index: {}]   ;;  %s3165_s21 = inlined_call_operand.vmem [shape: bf16[64,32], index: 21, kind: input, shape index: {}]   ;;  %s3166_s22 = inlined_call_operand.vmem [shape: f32[1,32], index: 22, kind: input, shape index: {}]   ;;  %s3167_s23 = inlined_call_operand.vmem [shape: f32[1,32], index: 23, kind: input, shape index: {}]   ;;  %s3168_s24 = inlined_call_operand.vmem [shape: f32[1,32], index: 24, kind: input, shape index: {}]   ;;  %s3169_s25 = inlined_call_operand.hbm [shape: f32[2,8,128], index: 25, kind: output, shape index: {}]  }
   0x1   :  { %3195 = sst [smem:[#allocation23_spill]] %s3144_s0 }
   0x2   :  { %3196 = sst [smem:[#allocation24_spill]] %s3145_s1 }
   0x3   :  { %3197 = sst [smem:[#allocation25_spill]] %s3146_s2 }
   0x4   :  { %3198 = sst [smem:[#allocation26_spill]] %s3147_s3 }
   0x5   :  { %3199 = sst [smem:[#allocation27_spill]] %s3148_s4 }
   0x6   :  { %3200 = sst [smem:[#allocation28_spill]] %s3149_s5 }
   0x7   :  { %3201 = sst [smem:[#allocation29_spill]] %s3150_s6 }
   0x8   :  { %3202 = sst [smem:[#allocation30_spill]] %s3151_s7 }
   0x9   :  { %3203 = sst [smem:[#allocation31_spill]] %s3152_s8 }
   0xa   :  { %3204 = sst [smem:[#allocation32_spill]] %s3153_s9 }
   0xb   :  { %3205 = sst [smem:[#allocation33_spill]] %s3156_s12 }
   0xc   :  { %3206 = sst [smem:[#allocation34_spill]] %s3168_s24 }
   0xd   :  { %3207 = sst [smem:[#allocation35_spill]] %s3169_s25 }
   0xe   :  { %30 = vsyncpa [#allocation3], 0 }
   0xf   :  { %31 = vsyncpa [#allocation6], 0 }
  0x10   :  { %32 = vsyncpa [#allocation9], 0 }
  0x11   :  { %33 = vsyncpa [#allocation4], 0 }
  0x12   :  { %35 = vsyncpa [#allocation4 + $0x1], 0  ;;  %s2755_s29 = smov 0   ;;  %s2757_s2 = smov 0  }
  0x13   :  { %s2759_s6 = smov 0   ;;  %s2761_s30 = smov 0  }
  0x14 LB: > { %3208 = sst [smem:[#allocation16_spill]] %s2588_s29  ;;  %s2776_s7 = sadd.s32 4294967295, %s2600_s30   ;;  %s2600_s30 = sphi %s2761_s30, %s3246_s30   ;;  %s2596_s6 = sphi %s2759_s6, %s3248_s6   ;;  %s2592_s2 = sphi %s2757_s2, %s3250_s2   ;;  %s2588_s29 = sphi %s2755_s29, %s3249_s29  }
  0x15   : > { %3209 = sst [smem:[#allocation17_spill]] %s2596_s6  ;;  %s2085_s3 = sadd.s32 4294967294, %s2600_s30  }
  0x16   : > { %3210 = sst [smem:[#allocation18_spill]] %s2600_s30  ;;  %s2780_s26 = sadd.s32 1, %s2600_s30  }
  0x17   : > { %3211 = sst [smem:[#allocation19_spill]] %s2780_s26  ;;  %s598_s1 = sadd.s32 1, %s2596_s6 }
  0x18   : > { %s595_s8 = ssub.s32 %s2600_s30, %s2780_s26  ;;  %p608_p0 = scmp.ne.s32.totalorder %s2596_s6, %s2592_s2 }
  0x19   : > { %p596_p1 = scmp.eq.s32.totalorder %s595_s8, 0  ;;  %p609_p2 = scmp.eq.s32.totalorder %s2776_s7, 1 }
  0x1a   : > { %p614_p3 = scmp.ne.s32.totalorder %s2592_s2, %s2588_s29  ;;  %p615_p4 = scmp.eq.s32.totalorder %s2085_s3, 1 }
  0x1b   : > { %s2791_s27 = scalar_select %p596_p1, %s2596_s6, %s598_s1  }
  0x1c   : > { %p2793_p5 = por %p609_p2, %p608_p0  ;;  %p2797_p6 = por %p615_p4, %p614_p3 }
  0x1d   : > { %3212 = sst [smem:[#allocation20_spill]] %s2791_s27  ;;  %p2086_p7 = scmp.ge.s32.totalorder %s2600_s30, 1 }
  0x1e   : > { %s3213_s4 = scalar_select %p2793_p5, 1, 0 }
  0x1f   : > { %s3215_s28 = scalar_select %p2797_p6, 1, 0 }
  0x20   : > { %3214 = sst [smem:[#allocation21_spill]] %s3213_s4  ;;  %p622_p8 = scmp.lt.s32.totalorder %s2600_s30, 3 }
  0x21   : > { %3216 = sst [smem:[#allocation22_spill]] %s3215_s28  ;;  %p2256_p9 = scmp.eq.s32.totalorder %s2776_s7, 0 }
  0x22   : > { %p2804_p10 = pnand %p2086_p7, %p622_p8  ;;  %s3218_s3 = sld [smem:[#allocation32_spill]] }
  0x23   : > { %s2602_s8 = smov [#allocation5]   ;;  %s3219_s12 = sld [smem:[#allocation33_spill]] }
  0x24   : > { %p2236_p11 = pneg %p2804_p10  ;;  %s657_s27 = sshll.u32 %s2602_s8, 4  ;;  %s658_s27 = int_to_ptr.vmem [resolvable:$true] %s657_s27 }
  0x25   : > { %s2603_s4 = smov [#allocation8]   ;;  %s2604_s25 = smov [#allocation2]  }
  0x26   : > { %p2818_p12 = pnand %p2256_p9, %p2236_p11  ;;  %s684_s8 = sshll.u32 %s2603_s4, 4  ;;  %s685_s8 = int_to_ptr.vmem [resolvable:$true] %s684_s8 }
  0x27   : > { %s645_s24 = sshll.u32 %s2604_s25, 4  ;;  %s2605_s5 = smov [#allocation7]   ;;  %s646_s24 = int_to_ptr.vmem [resolvable:$true] %s645_s24 }
  0x28   : > { %s655_s1 = sshll.u32 %s3218_s3, 4  ;;  %s3221_s3 = sld [smem:[#allocation31_spill]]  ;;  %s656_s1 = int_to_ptr.hbm [resolvable:$true] %s655_s1 }
  0x29   : > { %s682_s28 = sshll.u32 %s3219_s12, 4  ;;  %s667_s12 = sshll.u32 %s3154_s10, 4  ;;  %s683_s28 = int_to_ptr.hbm [resolvable:$true] %s682_s28  ;;  %s668_s12 = int_to_ptr.hbm [resolvable:$true] %s667_s12 }
  0x2a   : > { %2242 = dma.hbm_to_vmem [thread:$0]  (!%p2818_p12), %s656_s1, 16, %s658_s27, [#allocation6]  }
  0x2b   : > { %2248 = dma.hbm_to_vmem [thread:$0]  (!%p2818_p12), %s683_s28, 16, %s685_s8, [#allocation9]  }
  0x2c   : > { %s669_s4 = sshll.u32 %s2605_s5, 4  ;;  %s711_s27 = sshll.u32 %s3163_s19, 4  ;;  %s670_s4 = int_to_ptr.vmem [resolvable:$true] %s669_s4  ;;  %s712_s27 = int_to_ptr.hbm [resolvable:$true] %s711_s27 }
  0x2d   : > { %2245 = dma.hbm_to_vmem [thread:$0]  (!%p2818_p12), %s668_s12, 16, %s670_s4, [#allocation6]  }
  0x2e   : > { %s643_s30 = sshll.u32 %s3221_s3, 4  ;;  %s2606_s28 = smov [#allocation10]   ;;  %s644_s30 = int_to_ptr.hbm [resolvable:$true] %s643_s30 }
  0x2f   : > { %2239 = dma.hbm_to_vmem [thread:$0]  (!%p2818_p12), %s644_s30, 16, %s646_s24, [#allocation3]  }
  0x30   : > { %s713_s1 = sshll.u32 %s2606_s28, 4  ;;  %s2607_s8 = smov 64   ;;  %s714_s1 = int_to_ptr.vmem [resolvable:$true] %s713_s1 }
  0x31   : > { %s2608_s6 = smov 4   ;;  %780 = sbr.rel (%p2804_p10) target bundleno = 3277 (0xccd), region = 120 }
  0x32   : > { %2251 = dma.hbm_to_vmem [thread:$0]  (!%p2818_p12), %s712_s27, 256, %s714_s1, [#allocation9], %s2607_s8, %s2607_s8, %s2608_s6  }
  0x36   : > { %2571 = dma.done.wait (%p2256_p9), [#allocation3], 16  }
  0x37   : > { %2573 = vsyncadd (%p2256_p9), [#allocation3], 4294967280 }
  0x38   : > { %2575 = dma.done.wait (%p2256_p9), [#allocation6], 32  }
  0x39   : > { %2577 = vsyncadd (%p2256_p9), [#allocation6], 4294967264 }
  0x3a   : > { %2579 = dma.done.wait (%p2256_p9), [#allocation9], 272  }
  0x3b   : > { %2581 = vsyncadd (%p2256_p9), [#allocation9], 4294967024  ;;  %p885_p13 = scmp.lt.s32.totalorder %s2776_s7, 1  ;;  %s3222_s30 = sld [smem:[#allocation23_spill]]  ;;  %vm934_vm0 = vcmask 261120   ;;  %vm955_vm1 = vcmask 64512  }
  0x3c   : > { %s3223_s4 = sld [smem:[#allocation28_spill]]  ;;  %s3190_s8 = smov 104   ;;  %vm1007_vm2 = vcmask 1043456  }
  0x3d   : > { %s2857_s12 = scalar_select %p885_p13, %s2776_s7, 1 }
  0x3e   : > { %s3224_s1 = sld [smem:[#allocation29_spill]]  ;;  %s3192_s6 = smov 120  }
  0x3f   : > { %s2860_s24 = sshll.u32 %s2857_s12, 3  ;;  %s3182_s25 = smov 96  }
  0x40   : > { %s3186_s29 = smov 80   ;;  %s3188_s26 = smov 112  }
  0x41   : > { %s888_s9 = scalar_lea.vmem %s3222_s30, %s2860_s24  ;;  %s3181_s30 = smov 72  }
  0x42   : > { %v2199_v0 = vld [vmem:[%s3223_s4 + $0x8] sm:$0xff]  ;;  %v2198_v1 = vld [vmem:[%s3223_s4] sm:$0xff]  ;;  %s3225_s3 = sld [smem:[#allocation26_spill]]  ;;  %s2616_s28 = smov 64  }
  0x43   : > { %v2872_v2 = vld [vmem:[%s888_s9] sm:$0xff]  ;;  %944 = vmatpush.bf16.msra.mxu0 %v2199_v0  ;;  %s3187_s9 = smov 88   ;;  %s2618_s5 = smov 56  }
  0x44   : > { %v918_v3 = vpack.c.bf16 %v2872_v2, %v2872_v2  ;;  %v2323_v4 = vld [vmem:[%s3224_s1] ss:$0 sm:$0xff]  ;;  %s2617_s1 = smov 48   ;;  %s2619_s0 = smov 40  }
  0x47   : > { %945 = vmatpush.bf16.msra.mxu0 %v2198_v1 }
  0x48   : > { %s901_s27 = scalar_lea.vmem %s3225_s3, %s2860_s24  ;;  %s3185_s3 = smov 8  }
  0x49   : > { %v911_v21 = vld [vmem:[%s901_s27] sm:$0xff]  ;;  %s3183_s27 = smov 16  }
  0x4a   : > { %2114 = vmatmul.msk.bf16.vlgmr.msra.gmra.mxu0 %vm934_vm0, %v918_v3 }
  0xc7   : > { %v947_v5 = vpop.f32.mrf.mxu0 }
  0xc8   : > { %v948_v6 = vadd.f32 %v2323_v4, %v947_v5 }
  0xca   : > { %v2880_v7 = vpack.c.bf16 %v948_v6, %v948_v6 }
  0xcc   : > { %1166 = vrot.lane.b32.xlu2 %v2880_v7, %s3190_s8  ;;  %1024 = vrot.lane.b32.xlu1 %v2880_v7, %s3192_s6  ;;  %s3234_s8 = smov 80   ;;  %s3235_s6 = smov 96  }
  0xcd   : > { %953 = vrot.lane.b32.xlu0 %v2880_v7, %s3182_s25  ;;  %s2197_s25 = sshll.u32 %s2857_s12, 4 }
  0xcf   : > { %v949_v8 = vpop.f32.mrf.mxu0 }
  0xd4   : > { %1097 = vrot.lane.b32.xlu2 %v2880_v7, %s3186_s29  ;;  %1168 = vrot.lane.b32.xlu1 %v2880_v7, %s3181_s30  ;;  %s3228_s29 = sld [smem:[#allocation24_spill]] }
  0xd5   : > { %1026 = vrot.lane.b32.xlu0 %v2880_v7, %s3187_s9 }
  0xda   : > { %s893_s9 = scalar_lea.vmem %s3228_s29, %s2197_s25  ;;  %s3231_s25 = smov 112  }
  0xdb   : > { %s3236_s29 = smov 72  }
  0xdd   : > { %1095 = vrot.lane.b32.xlu0 %v2880_v7, %s3188_s26  ;;  %s3238_s26 = smov 24  }
 0x126   : > { %v1167_v9 = vpop.permute.xlu2 %1166 }
 0x12e   : > { %v1098_v10 = vpop.permute.xlu2 %1097 }
 0x12f   : > { %v1103_v11 = vsel %vm955_vm1, %v1098_v10, 0 }
 0x130   : > { %1112 = vmatpush.bf16.xpose.msrb.mxu0 %v1103_v11 }
 0x13e   : > { %v1025_v12 = vpop.permute.xlu1 %1024 }
 0x13f   : > { %v954_v13 = vpop.permute.xlu0 %953 }
 0x140   : > { %v960_v14 = vsel %vm955_vm1, %v954_v13, 0 }
 0x141   : > { %969 = vmatpush.bf16.xpose.msra.mxu1 %v960_v14 }
 0x146   : > { %v1169_v15 = vpop.permute.xlu1 %1168 }
 0x147   : > { %v1027_v16 = vpop.permute.xlu0 %1026  ;;  %v1174_v17 = vsel %vm955_vm1, %v1169_v15, 0 }
 0x148   : > { %2115 = vmatmul.msk.bf16.vlgmr.msra.gmra.mxu1 %vm955_vm1, %v2880_v7  ;;  %v1032_v18 = vsel %vm955_vm1, %v1027_v16, 0 }
 0x149   : > { %1041 = vmatpush.bf16.xpose.msra.mxu3 %v1032_v18 }
 0x14f   : > { %v1096_v19 = vpop.permute.xlu0 %1095 }
 0x150   : > { %2117 = vmatmul.msk.bf16.vlgmr.msra.gmra.mxu3 %vm955_vm1, %v1025_v12  ;;  %2119 = vmatmul.msk.bf16.vlgmr.msrb.gmra.mxu0 %vm955_vm1, %v1096_v19 }
 0x151   : > { %1183 = vmatpush.bf16.xpose.msrb.mxu3 %v1174_v17 }
 0x160   : > { %2121 = vmatmul.msk.bf16.vlgmr.msrb.gmra.mxu3 %vm955_vm1, %v1167_v9 }
 0x1c5   : > { %v971_v20 = vpop.f32.mrf.mxu1 }
 0x1c6   : > { %v975_v22 = vmul.f32 0.35355338, %v971_v20 }
 0x1c8   : > { %v976_v23 = vadd.f32 %v975_v22, %v911_v21 }
 0x1ca   : > { %v977_v24 = vsel %vm955_vm1, %v976_v23, -inf }
 0x1cb   : > { %978 = vmax.xlane.f32.xlu1 %v977_v24 }
 0x1cd   : > { %v973_v25 = vpop.f32.mrf.mxu1  ;;  %v1114_v26 = vpop.f32.mrf.mxu0 }
 0x1ce   : > { %v1118_v31 = vmul.f32 0.35355338, %v1114_v26 }
 0x1d0   : > { %v1119_v34 = vadd.f32 %v1118_v31, %v911_v21 }
 0x1d2   : > { %v1120_v35 = vsel %vm955_vm1, %v1119_v34, -inf }
 0x1d3   : > { %v1043_v27 = vpop.f32.mrf.mxu3 }
 0x1d4   : > { %v1047_v28 = vmul.f32 0.35355338, %v1043_v27 }
 0x1d5   : > { %v1116_v29 = vpop.f32.mrf.mxu0 }
 0x1d6   : > { %v1048_v30 = vadd.f32 %v1047_v28, %v911_v21 }
 0x1d8   : > { %v1049_v32 = vsel %vm955_vm1, %v1048_v30, -inf }
 0x1d9   : > { %1050 = vmax.xlane.f32.xlu2 %v1049_v32 }
 0x1db   : > { %v1045_v33 = vpop.f32.mrf.mxu3 }
 0x1e1   : > { %1121 = vmax.xlane.f32.xlu2 %v1120_v35 }
 0x1e3   : > { %v1185_v36 = vpop.f32.mrf.mxu3 }
 0x1e4   : > { %v1189_v37 = vmul.f32 0.35355338, %v1185_v36 }
 0x1e6   : > { %v1190_v38 = vadd.f32 %v1189_v37, %v911_v21 }
 0x1e8   : > { %v1191_v39 = vsel %vm955_vm1, %v1190_v38, -inf }
 0x1e9   : > { %1192 = vmax.xlane.f32.xlu0 %v1191_v39 }
 0x1eb   : > { %v1187_v40 = vpop.f32.mrf.mxu3 }
 0x1fd   : > { %1002 = vrot.lane.b32.xlu0 %v2880_v7, %s2616_s28  ;;  %s3184_s28 = smov 24  }
 0x205   : > { %1145 = vrot.lane.b32.xlu0 %v2880_v7, %s2617_s1  ;;  %s3241_s1 = sld [smem:[#allocation35_spill]] }
 0x23e   : > { %v979_v41 = vpop.xlane.xlu1 %978 }
 0x23f   : > { %v980_v42 = vsub.f32 %v976_v23, %v979_v41 }
 0x241   : > { %v981_v43 = vmul.f32 1.442695, %v980_v42 }
 0x243   : > { %2336 = vpow2.f32 %v981_v43 }
 0x249   : > { %v2337_v44 = vpop.eup %2336 }
 0x24a   : > { %v983_v45 = vsel %vm955_vm1, %v2337_v44, 0.0 }
 0x24b   : > { %984 = vadd.xlane.f32.xlu1 %v983_v45 }
 0x24c   : > { %v1051_v46 = vpop.xlane.xlu2 %1050 }
 0x24d   : > { %v1052_v47 = vsub.f32 %v1048_v30, %v1051_v46 }
 0x24f   : > { %v1053_v48 = vmul.f32 1.442695, %v1052_v47 }
 0x251   : > { %2338 = vpow2.f32 %v1053_v48 }
 0x254   : > { %v1122_v49 = vpop.xlane.xlu2 %1121 }
 0x255   : > { %v1123_v50 = vsub.f32 %v1119_v34, %v1122_v49 }
 0x257   : > { %v2916_v51 = vpop.eup %2338  ;;  %v1124_v52 = vmul.f32 1.442695, %v1123_v50 }
 0x258   : > { %v1055_v53 = vsel %vm955_vm1, %v2916_v51, 0.0 }
 0x259   : > { %2340 = vpow2.f32 %v1124_v52  ;;  %1056 = vadd.xlane.f32.xlu2 %v1055_v53 }
 0x25c   : > { %v1193_v54 = vpop.xlane.xlu0 %1192 }
 0x25d   : > { %v1194_v55 = vsub.f32 %v1190_v38, %v1193_v54 }
 0x25f   : > { %v2920_v56 = vpop.eup %2340  ;;  %v1195_v57 = vmul.f32 1.442695, %v1194_v55 }
 0x260   : > { %v1126_v58 = vsel %vm955_vm1, %v2920_v56, 0.0 }
 0x261   : > { %2342 = vpow2.f32 %v1195_v57  ;;  %1127 = vadd.xlane.f32.xlu1 %v1126_v58 }
 0x267   : > { %v2924_v59 = vpop.eup %2342 }
 0x268   : > { %v1197_v60 = vsel %vm955_vm1, %v2924_v59, 0.0 }
 0x269   : > { %1198 = vadd.xlane.f32.xlu1 %v1197_v60 }
 0x26f   : > { %v1003_v61 = vpop.permute.xlu0 %1002 }
 0x270   : > { %v1009_v62 = vsel %vm1007_vm2, %v1003_v61, 0 }
 0x271   : > { %1074 = vrot.lane.b32.xlu2 %v2880_v7, %s2618_s5  ;;  %1018 = vmatpush.bf16.msra.mxu2 %v1009_v62  ;;  %s3227_s5 = sld [smem:[#allocation25_spill]] }
 0x277   : > { %v1146_v63 = vpop.permute.xlu0 %1145 }
 0x278   : > { %v1151_v0 = vsel %vm1007_vm2, %v1146_v63, 0 }
 0x279   : > { %1160 = vmatpush.bf16.msrb.mxu1 %v1151_v0 }
 0x282   : > { %1216 = vrot.lane.b32.xlu1 %v2880_v7, %s2619_s0  ;;  %s3226_s0 = sld [smem:[#allocation30_spill]] }
 0x2be   : > { %v985_v1 = vpop.xlane.xlu1 %984 }
 0x2bf   : > { %2344 = vrcp.f32 %v985_v1  ;;  %v997_v6 = vand.u32 2147483648, %v985_v1  ;;  %v995_v9 = vand.u32 2147483647, %v985_v1  ;;  %vm991_vm4 = vweird.f32 %v985_v1 }
 0x2c1   : > { %v998_v12 = vor.u32 1.1754944e-38, %v997_v6  ;;  %vm996_vm6 = vcmp.eq.f32.partialorder %v995_v9, 8.507059e+37 }
 0x2c5   : > { %v2345_v3 = vpop.eup %2344 }
 0x2c6   : > { %v987_v4 = vmul.f32 %v2345_v3, %v985_v1  ;;  %vm992_vm3 = vweird.f32 %v2345_v3 }
 0x2c7   : > { %vm993_vm5 = vmor %vm991_vm4, %vm992_vm3 }
 0x2c8   : > { %v988_v5 = vsub.f32 1.0, %v987_v4  ;;  %v2200_v4 = vld [vmem:[%s3226_s0] sm:$0xff] }
 0x2ca   : > { %v989_v8 = vmul.f32 %v2345_v3, %v988_v5 }
 0x2cc   : > { %v1057_v10 = vpop.xlane.xlu2 %1056  ;;  %v990_v11 = vadd.f32 %v2345_v3, %v989_v8 }
 0x2cd   : > { %2346 = vrcp.f32 %v1057_v10  ;;  %v1069_v23 = vand.u32 2147483648, %v1057_v10  ;;  %v1067_v24 = vand.u32 2147483647, %v1057_v10  ;;  %vm1063_vm8 = vweird.f32 %v1057_v10 }
 0x2ce   : > { %v994_v13 = vsel %vm993_vm5, %v2345_v3, %v990_v11  ;;  %v2201_v3 = vld [vmem:[%s3226_s0 + $0x8] sm:$0xff] }
 0x2cf   : > { %v999_v14 = vsel %vm996_vm6, %v998_v12, %v994_v13  ;;  %v1070_v27 = vor.u32 1.1754944e-38, %v1069_v23  ;;  %vm1068_vm10 = vcmp.eq.f32.partialorder %v1067_v24, 8.507059e+37  ;;  %1286 = vmatpush.bf16.msra.mxu0 %v2201_v3  ;;  %vm1252_vm6 = vcmask 195584   ;;  %v2324_v13 = vld [vmem:[#allocation2] ss:$0 sm:$0xff] }
 0x2d0   : > { %v1000_v15 = vmul.f32 %v2337_v44, %v999_v14  ;;  %v909_v23 = vld [vmem:[%s893_s9 + $0x8] sm:$0x3] }
 0x2d2   : > { %v1001_v7 = vpack.c.bf16 %v1000_v15, %v1000_v15 }
 0x2d3   : > { %v2347_v16 = vpop.eup %2346  ;;  %1287 = vmatpush.bf16.msra.mxu0 %v2200_v4  ;;  %v2328_v4 = vld [vmem:[#allocation8] ss:$0 sm:$0xff] }
 0x2d4   : > { %v1059_v17 = vmul.f32 %v2347_v16, %v1057_v10  ;;  %v1128_v18 = vpop.xlane.xlu1 %1127  ;;  %v1075_v19 = vpop.permute.xlu2 %1074  ;;  %2116 = vmatmul.msk.bf16.vlgmr.msra.gmra.mxu2 %vm955_vm1, %v1001_v7  ;;  %vm1064_vm7 = vweird.f32 %v2347_v16 }
 0x2d5   : > { %2348 = vrcp.f32 %v1128_v18  ;;  %v1080_v21 = vsel %vm1007_vm2, %v1075_v19, 0  ;;  %vm1065_vm9 = vmor %vm1063_vm8, %vm1064_vm7  ;;  %v1140_v33 = vand.u32 2147483648, %v1128_v18  ;;  %v1138_v36 = vand.u32 2147483647, %v1128_v18 }
 0x2d6   : > { %v1060_v20 = vsub.f32 1.0, %v1059_v17  ;;  %1089 = vmatpush.bf16.msrb.mxu2 %v1080_v21  ;;  %vm1134_vm12 = vweird.f32 %v1128_v18  ;;  %v2204_v21 = vld [vmem:[%s3157_s13] sm:$0xff] }
 0x2d7   : > { %v1141_v40 = vor.u32 1.1754944e-38, %v1140_v33  ;;  %vm1139_vm14 = vcmp.eq.f32.partialorder %v1138_v36, 8.507059e+37  ;;  %v2203_v36 = vld [vmem:[%s3155_s11 + $0x8] sm:$0xff] }
 0x2d8   : > { %v1061_v22 = vmul.f32 %v2347_v16, %v1060_v20  ;;  %v2624_v20 = vmov 0   ;;  %1367 = vmatpush.bf16.msra.mxu1 %v2203_v36 }
 0x2d9   : > { %2322 = vset.pattern.permute.xlu0 %v2624_v20 }
 0x2da   : > { %v1062_v25 = vadd.f32 %v2347_v16, %v1061_v22  ;;  %v908_v22 = vld [vmem:[%s893_s9] sm:$0xff]  ;;  %s3237_s9 = smov 8  }
 0x2db   : > { %v2349_v26 = vpop.eup %2348 }
 0x2dc   : > { %v1130_v28 = vmul.f32 %v2349_v26, %v1128_v18  ;;  %v1199_v29 = vpop.xlane.xlu1 %1198  ;;  %v1066_v30 = vsel %vm1065_vm9, %v2347_v16, %v1062_v25  ;;  %vm1135_vm11 = vweird.f32 %v2349_v26  ;;  %v2623_v18 = vmov 32.0  }
 0x2dd   : > { %2350 = vrcp.f32 %v1199_v29  ;;  %v1071_v32 = vsel %vm1068_vm10, %v1070_v27, %v1066_v30  ;;  %vm1136_vm13 = vmor %vm1134_vm12, %vm1135_vm11  ;;  %v1211_v49 = vand.u32 2147483648, %v1199_v29  ;;  %vm1205_vm3 = vweird.f32 %v1199_v29 }
 0x2de   : > { %v1131_v31 = vsub.f32 1.0, %v1130_v28  ;;  %v1072_v34 = vmul.f32 %v2916_v51, %v1071_v32  ;;  %v1209_v50 = vand.u32 2147483647, %v1199_v29  ;;  %2352 = vrcp.f32 %v2623_v18 }
 0x2df   : > { %v1212_v52 = vor.u32 1.1754944e-38, %v1211_v49  ;;  %v1379_v25 = vpack.c.bf16 %v909_v23, %v908_v22  ;;  %vm1435_vm11 = vcmask 80896   ;;  %vm1467_vm12 = vcmask 1044480  }
 0x2e0   : > { %v1132_v35 = vmul.f32 %v2349_v26, %v1131_v31  ;;  %v1073_v38 = vpack.c.bf16 %v1072_v34, %v1072_v34  ;;  %vm1210_vm5 = vcmp.eq.f32.partialorder %v1209_v50, 8.507059e+37 }
 0x2e2   : > { %v1133_v37 = vadd.f32 %v2349_v26, %v1132_v35 }
 0x2e3   : > { %v2351_v39 = vpop.eup %2350 }
 0x2e4   : > { %v1201_v41 = vmul.f32 %v2351_v39, %v1199_v29  ;;  %2118 = vmatmul.msk.bf16.vlgmr.msrb.gmra.mxu2 %vm955_vm1, %v1073_v38  ;;  %v1137_v42 = vsel %vm1136_vm13, %v2349_v26, %v1133_v37  ;;  %vm1206_vm15 = vweird.f32 %v2351_v39  ;;  %v2353_v24 = vpop.eup %2352  ;;  %v2202_v37 = vld [vmem:[%s3155_s11] sm:$0xff] }
 0x2e5   : > { %v1142_v43 = vsel %vm1139_vm14, %v1141_v40, %v1137_v42  ;;  %vm1207_vm4 = vmor %vm1205_vm3, %vm1206_vm15  ;;  %v1298_v26 = vmul.f32 32.0, %v2353_v24  ;;  %vm1302_vm7 = vweird.f32 %v2353_v24  ;;  %1368 = vmatpush.bf16.msra.mxu1 %v2202_v37  ;;  %v2327_v42 = vld [vmem:[%s3158_s14] ss:$0 sm:$0xff] }
 0x2e6   : > { %v1202_v44 = vsub.f32 1.0, %v1201_v41  ;;  %v1143_v45 = vmul.f32 %v2920_v56, %v1142_v43 }
 0x2e7   : > { %v1299_v27 = vsub.f32 1.0, %v1298_v26 }
 0x2e8   : > { %v1203_v46 = vmul.f32 %v2351_v39, %v1202_v44  ;;  %v1144_v47 = vpack.c.bf16 %v1143_v45, %v1143_v45 }
 0x2e9   : > { %v1300_v28 = vmul.f32 %v2353_v24, %v1299_v27 }
 0x2ea   : > { %v1204_v48 = vadd.f32 %v2351_v39, %v1203_v46  ;;  %2120 = vmatmul.msk.bf16.vlgmr.msrb.gmra.mxu1 %vm955_vm1, %v1144_v47 }
 0x2eb   : > { %v1301_v29 = vadd.f32 %v2353_v24, %v1300_v28 }
 0x2ec   : > { %v1208_v51 = vsel %vm1207_vm4, %v2351_v39, %v1204_v48 }
 0x2ed   : > { %v1213_v53 = vsel %vm1210_vm5, %v1212_v52, %v1208_v51  ;;  %v2971_v30 = vsel %vm1302_vm7, %v2353_v24, %v1301_v29 }
 0x2ee   : > { %v1214_v54 = vmul.f32 %v2924_v59, %v1213_v53 }
 0x2f0   : > { %v1215_v56 = vpack.c.bf16 %v1214_v54, %v1214_v54  ;;  %v2325_v54 = vld [vmem:[#allocation5] ss:$0 sm:$0xff] }
 0x2f4   : > { %v1217_v55 = vpop.permute.xlu1 %1216 }
 0x2f5   : > { %v1222_v57 = vsel %vm1007_vm2, %v1217_v55, 0  ;;  %vm1250_vm2 = vcmask 130048  }
 0x2f6   : > { %1231 = vmatpush.bf16.msra.mxu2 %v1222_v57 }
 0x2f9   : > { %2122 = vmatmul.msk.bf16.vlgmr.msra.gmra.mxu2 %vm955_vm1, %v1215_v56  ;;  %v2326_v56 = vld [vmem:[#allocation7] ss:$0 sm:$0xff] }
 0x357   : > { %v1020_v58 = vpop.f32.mrf.mxu2 }
 0x35f   : > { %v1022_v60 = vpop.f32.mrf.mxu2 }
 0x367   : > { %v1091_v61 = vpop.f32.mrf.mxu2  ;;  %v1162_v62 = vpop.f32.mrf.mxu1 }
 0x368   : > { %1238 = vrot.lane.b32.xlu0 %v1091_v61, %s3185_s3  ;;  %1242 = vrot.lane.b32.xlu2 %v1162_v62, %s3183_s27  ;;  %s897_s27 = scalar_lea.vmem %s3227_s5, %s2860_s24  ;;  %s3232_s5 = sld [smem:[#allocation27_spill]] }
 0x369   : > { %v910_v19 = vld [vmem:[%s897_s27] sm:$0xff]  ;;  %s3229_s27 = smov 120   ;;  %s3239_s3 = smov 16  }
 0x36e   : > { %s905_s12 = scalar_lea.vmem %s3232_s5, %s2860_s24  ;;  %s3233_s24 = smov 88  }
 0x36f   : > { %v1093_v63 = vpop.f32.mrf.mxu2  ;;  %v1164_v0 = vpop.f32.mrf.mxu1 }
 0x37c   : > { %v1233_v59 = vpop.f32.mrf.mxu2 }
 0x37d   : > { %1246 = vrot.lane.b32.xlu0 %v1233_v59, %s3184_s28  ;;  %s3230_s28 = smov 104  }
 0x384   : > { %v1235_v1 = vpop.f32.mrf.mxu2 }
 0x385   : > { %1333 = vperm.xlu0 %2322, %v910_v19  }
 0x3c2   : > { %v1243_v8 = vpop.permute.xlu2 %1242 }
 0x3da   : > { %v1239_v5 = vpop.permute.xlu0 %1238 }
 0x3db   : > { %v1249_v6 = vsel %vm955_vm1, %v1020_v58, %v1239_v5 }
 0x3dc   : > { %v1251_v9 = vsel %vm1250_vm2, %v1249_v6, %v1243_v8 }
 0x3ef   : > { %v1247_v10 = vpop.permute.xlu0 %1246 }
 0x3f0   : > { %v1253_v11 = vsel %vm1252_vm6, %v1251_v9, %v1247_v10 }
 0x3f1   : > { %v1261_v12 = vpack.c.bf16 %v1253_v11, %v1253_v11 }
 0x3f3   : > { %2131 = vmatmul.msk.bf16.vlgmr.msra.gmra.mxu0 %vm934_vm0, %v1261_v12 }
 0x3f7   : > { %v2993_v60 = vpop.permute.xlu0 %1333 }
 0x470   : > { %v1289_v14 = vpop.f32.mrf.mxu0 }
 0x471   : > { %v1290_v15 = vadd.f32 %v2324_v13, %v1289_v14 }
 0x473   : > { %v1293_v7 = vadd.f32 %v1290_v15, %v2872_v2  ;;  %v2205_v2 = vld [vmem:[%s3157_s13 + $0x8] sm:$0xff] }
 0x474   : > { %1404 = vmatpush.bf16.msra.mxu3 %v2205_v2 }
 0x475   : > { %v1294_v16 = vsel %vm934_vm0, %v1293_v7, 0.0 }
 0x476   : > { %1295 = vadd.xlane.f32.xlu2 %v1294_v16 }
 0x478   : > { %v1291_v17 = vpop.f32.mrf.mxu0  ;;  %1405 = vmatpush.bf16.msra.mxu3 %v2204_v21 }
 0x47b   : > { %2149 = vmatmul.msk.bf16.vlgmr.msra.gmra.mxu3 %vm934_vm0, %v1379_v25 }
 0x4e9   : > { %v1296_v31 = vpop.xlane.xlu2 %1295 }
 0x4ea   : > { %v1304_v32 = vmul.f32 %v2971_v30, %v1296_v31 }
 0x4ec   : > { %v1305_v33 = vsub.f32 %v1293_v7, %v1304_v32  ;;  %v912_v7 = vld [vmem:[%s905_s12] sm:$0xff] }
 0x4ee   : > { %v1306_v34 = vmul.f32 %v1305_v33, %v1305_v33 }
 0x4f0   : > { %v1307_v35 = vsel %vm934_vm0, %v1306_v34, 0.0 }
 0x4f1   : > { %1308 = vadd.xlane.f32.xlu1 %v1307_v35 }
 0x4fe   : > { %v1407_v40 = vpop.f32.mrf.mxu3 }
 0x4ff   : > { %v1408_v43 = vadd.f32 %v2327_v42, %v1407_v40 }
 0x506   : > { %v1409_v44 = vpop.f32.mrf.mxu3 }
 0x507   : > { %v1410_v45 = vadd.f32 %v2327_v42, %v1409_v44 }
 0x509   : > { %v2985_v48 = vpack.c.bf16 %v1410_v45, %v1408_v43 }
 0x50b   : > { %1487 = vrot.lane.b32.xlu0 %v2985_v48, %s3229_s27  ;;  %1629 = vrot.lane.b32.xlu2 %v2985_v48, %s3230_s28  ;;  %v1418_v50 = vsel %vm955_vm1, %v2985_v48, 0 }
 0x50c   : > { %1427 = vmatpush.bf16.xpose.msrb.mxu2 %v1418_v50 }
 0x564   : > { %v1309_v38 = vpop.xlane.xlu1 %1308 }
 0x565   : > { %v1310_v39 = vmul.f32 %v1309_v38, %v2971_v30  ;;  %v1630_v59 = vpop.permute.xlu2 %1629 }
 0x566   : > { %v1635_v3 = vsel %vm955_vm1, %v1630_v59, 0 }
 0x567   : > { %v1311_v41 = vadd.f32 1e-05, %v1310_v39 }
 0x569   : > { %2354 = vrsqrt.f32 %v1311_v41  ;;  %vm1318_vm9 = vweird.f32 %v1311_v41 }
 0x56f   : > { %v2355_v46 = vpop.eup %2354 }
 0x570   : > { %v1313_v47 = vmul.f32 %v2355_v46, %v1311_v41  ;;  %vm1319_vm8 = vweird.f32 %v2355_v46 }
 0x571   : > { %vm1320_vm10 = vmor %vm1318_vm9, %vm1319_vm8 }
 0x572   : > { %v1314_v49 = vmul.f32 %v2355_v46, %v1313_v47 }
 0x574   : > { %v1315_v51 = vmul.f32 0.5, %v1314_v49 }
 0x576   : > { %v1316_v52 = vsub.f32 1.5, %v1315_v51 }
 0x578   : > { %v1317_v53 = vmul.f32 %v2355_v46, %v1316_v52 }
 0x57a   : > { %v1321_v55 = vsel %vm1320_vm10, %v2355_v46, %v1317_v53 }
 0x57b   : > { %v1322_v57 = vmul.f32 %v1321_v55, %v1305_v33 }
 0x57d   : > { %v1326_v58 = vmul.f32 %v2325_v54, %v1322_v57  ;;  %v1488_v0 = vpop.permute.xlu0 %1487 }
 0x57e   : > { %v1493_v1 = vsel %vm955_vm1, %v1488_v0, 0 }
 0x57f   : > { %v1330_v61 = vadd.f32 %v2326_v56, %v1326_v58  ;;  %1502 = vmatpush.bf16.xpose.msrb.mxu1 %v1493_v1 }
 0x581   : > { %v2996_v62 = vmul.f32 %v2993_v60, %v1330_v61 }
 0x583   : > { %v1342_v63 = vpack.c.bf16 %v2996_v62, %v2996_v62 }
 0x585   : > { %2140 = vmatmul.msk.bf16.vlgmr.msra.gmra.mxu1 %vm934_vm0, %v1342_v63 }
 0x587   : > { %1644 = vmatpush.bf16.xpose.msra.mxu1 %v1635_v3 }
 0x602   : > { %v1370_v5 = vpop.f32.mrf.mxu1 }
 0x603   : > { %v1371_v6 = vadd.f32 %v2328_v4, %v1370_v5 }
 0x605   : > { %v1412_v8 = vpack.c.bf16 %v1371_v6, %v1371_v6 }
 0x607   : > { %1556 = vrot.lane.b32.xlu1 %v1412_v8, %s3231_s25  ;;  %1485 = vrot.lane.b32.xlu0 %v1412_v8, %s3229_s27 }
 0x608   : > { %2150 = vmatmul.msk.bf16.vlgmr.msrb.gmra.mxu2 %vm955_vm1, %v1412_v8 }
 0x60a   : > { %v1372_v9 = vpop.f32.mrf.mxu1 }
 0x60f   : > { %1558 = vrot.lane.b32.xlu0 %v2985_v48, %s3231_s25 }
 0x617   : > { %1627 = vrot.lane.b32.xlu0 %v1412_v8, %s3230_s28  ;;  %s3240_s28 = sld [smem:[#allocation34_spill]] }
 0x679   : > { %v1486_v10 = vpop.permute.xlu0 %1485  ;;  %v1557_v13 = vpop.permute.xlu1 %1556 }
 0x67a   : > { %2152 = vmatmul.msk.bf16.vlgmr.msrb.gmra.mxu1 %vm955_vm1, %v1486_v10 }
 0x681   : > { %v1559_v11 = vpop.permute.xlu0 %1558 }
 0x682   : > { %v1564_v12 = vsel %vm955_vm1, %v1559_v11, 0 }
 0x683   : > { %1573 = vmatpush.bf16.xpose.msra.mxu2 %v1564_v12 }
 0x689   : > { %v1628_v14 = vpop.permute.xlu0 %1627 }
 0x68a   : > { %2154 = vmatmul.msk.bf16.vlgmr.msra.gmra.mxu2 %vm955_vm1, %v1557_v13  ;;  %2156 = vmatmul.msk.bf16.vlgmr.msra.gmra.mxu1 %vm955_vm1, %v1628_v14 }
 0x68b   : > { %v1429_v15 = vpop.f32.mrf.mxu2 }
 0x68c   : > { %v1433_v16 = vmul.f32 0.35355338, %v1429_v15 }
 0x68e   : > { %v1434_v17 = vadd.f32 %v1433_v16, %v912_v7 }
 0x690   : > { %v1436_v18 = vsel %vm1435_vm11, %v1434_v17, -inf }
 0x691   : > { %1437 = vmax.xlane.f32.xlu2 %v1436_v18 }
 0x693   : > { %v1431_v19 = vpop.f32.mrf.mxu2 }
 0x6f7   : > { %v1504_v2 = vpop.f32.mrf.mxu1 }
 0x6f8   : > { %v1508_v20 = vmul.f32 0.35355338, %v1504_v2 }
 0x6fa   : > { %v1509_v21 = vadd.f32 %v1508_v20, %v912_v7 }
 0x6fc   : > { %v1510_v22 = vsel %vm1435_vm11, %v1509_v21, -inf }
 0x6fd   : > { %1511 = vmax.xlane.f32.xlu0 %v1510_v22 }
 0x6ff   : > { %v1506_v23 = vpop.f32.mrf.mxu1 }
 0x704   : > { %v1438_v24 = vpop.xlane.xlu2 %1437 }
 0x705   : > { %v1439_v25 = vsub.f32 %v1434_v17, %v1438_v24 }
 0x707   : > { %v1440_v26 = vmul.f32 1.442695, %v1439_v25  ;;  %v1646_v27 = vpop.f32.mrf.mxu1 }
 0x708   : > { %v1650_v28 = vmul.f32 0.35355338, %v1646_v27 }
 0x709   : > { %2356 = vpow2.f32 %v1440_v26 }
 0x70a   : > { %v1651_v29 = vadd.f32 %v1650_v28, %v912_v7 }
 0x70c   : > { %v1652_v31 = vsel %vm1435_vm11, %v1651_v29, -inf }
 0x70d   : > { %v1575_v32 = vpop.f32.mrf.mxu2  ;;  %1653 = vmax.xlane.f32.xlu1 %v1652_v31 }
 0x70e   : > { %v1579_v33 = vmul.f32 0.35355338, %v1575_v32 }
 0x70f   : > { %v3020_v34 = vpop.eup %2356  ;;  %v1648_v35 = vpop.f32.mrf.mxu1 }
 0x710   : > { %v1442_v36 = vsel %vm1435_vm11, %v3020_v34, 0.0  ;;  %v1580_v37 = vadd.f32 %v1579_v33, %v912_v7 }
 0x711   : > { %1443 = vadd.xlane.f32.xlu2 %v1442_v36 }
 0x712   : > { %v1581_v38 = vsel %vm1435_vm11, %v1580_v37, -inf }
 0x713   : > { %1582 = vmax.xlane.f32.xlu0 %v1581_v38 }
 0x715   : > { %v1577_v39 = vpop.f32.mrf.mxu2 }
 0x726   : > { %1535 = vrot.lane.b32.xlu1 %v2985_v48, %s3233_s24 }
 0x72e   : > { %1606 = vrot.lane.b32.xlu1 %v2985_v48, %s3234_s8  ;;  %s882_s8 = sand.u32 1, %s2592_s2  }
 0x770   : > { %v1512_v40 = vpop.xlane.xlu0 %1511 }
 0x771   : > { %v1513_v41 = vsub.f32 %v1509_v21, %v1512_v40 }
 0x773   : > { %v1514_v42 = vmul.f32 1.442695, %v1513_v41 }
 0x775   : > { %2358 = vpow2.f32 %v1514_v42 }
 0x77b   : > { %v2359_v43 = vpop.eup %2358 }
 0x77c   : > { %v1516_v44 = vsel %vm1435_vm11, %v2359_v43, 0.0 }
 0x77d   : > { %1517 = vadd.xlane.f32.xlu0 %v1516_v44 }
 0x780   : > { %v1654_v45 = vpop.xlane.xlu1 %1653 }
 0x781   : > { %v1655_v46 = vsub.f32 %v1651_v29, %v1654_v45 }
 0x783   : > { %v1656_v47 = vmul.f32 1.442695, %v1655_v46 }
 0x784   : > { %v1444_v58 = vpop.xlane.xlu2 %1443 }
 0x785   : > { %2360 = vpow2.f32 %v1656_v47  ;;  %v1456_v19 = vand.u32 2147483648, %v1444_v58  ;;  %vm1450_vm5 = vweird.f32 %v1444_v58  ;;  %v1454_v2 = vand.u32 2147483647, %v1444_v58 }
 0x786   : > { %v1583_v49 = vpop.xlane.xlu0 %1582 }
 0x787   : > { %v1584_v50 = vsub.f32 %v1580_v37, %v1583_v49  ;;  %v1457_v26 = vor.u32 1.1754944e-38, %v1456_v19  ;;  %vm1455_vm9 = vcmp.eq.f32.partialorder %v1454_v2, 8.507059e+37 }
 0x789   : > { %v1585_v51 = vmul.f32 1.442695, %v1584_v50 }
 0x78b   : > { %v3030_v52 = vpop.eup %2360  ;;  %2362 = vpow2.f32 %v1585_v51 }
 0x78c   : > { %v1658_v53 = vsel %vm1435_vm11, %v3030_v52, 0.0 }
 0x78d   : > { %1659 = vadd.xlane.f32.xlu0 %v1658_v53 }
 0x791   : > { %v3034_v54 = vpop.eup %2362 }
 0x792   : > { %v1587_v55 = vsel %vm1435_vm11, %v3034_v54, 0.0 }
 0x793   : > { %1588 = vadd.xlane.f32.xlu2 %v1587_v55 }
 0x798   : > { %v1536_v57 = vpop.permute.xlu1 %1535 }
 0x799   : > { %v1541_v56 = vsel %vm1467_vm12, %v1536_v57, 0 }
 0x79a   : > { %1550 = vmatpush.bf16.msrb.mxu3 %v1541_v56 }
 0x7a0   : > { %v1607_v39 = vpop.permute.xlu1 %1606 }
 0x7a1   : > { %1462 = vrot.lane.b32.xlu0 %v2985_v48, %s3235_s6  ;;  %v1612_v45 = vsel %vm1467_vm12, %v1607_v39, 0 }
 0x7ab   : > { %1677 = vrot.lane.b32.xlu2 %v2985_v48, %s3236_s29 }
 0x7f0   : > { %v1518_v61 = vpop.xlane.xlu0 %1517 }
 0x7f1   : > { %2364 = vrcp.f32 %v1518_v61  ;;  %v1530_v3 = vand.u32 2147483648, %v1518_v61  ;;  %v1528_v6 = vand.u32 2147483647, %v1518_v61  ;;  %vm1524_vm14 = vweird.f32 %v1518_v61 }
 0x7f2   : > { %2366 = vrcp.f32 %v1444_v58 }
 0x7f3   : > { %v1531_v9 = vor.u32 1.1754944e-38, %v1530_v3  ;;  %vm1529_vm3 = vcmp.eq.f32.partialorder %v1528_v6, 8.507059e+37  ;;  %v2206_v3 = vld [vmem:[%s3159_s15] sm:$0xff] }
 0x7f7   : > { %v2365_v63 = vpop.eup %2364 }
 0x7f8   : > { %v1520_v0 = vmul.f32 %v2365_v63, %v1518_v61  ;;  %v2367_v59 = vpop.eup %2366  ;;  %vm1525_vm13 = vweird.f32 %v2365_v63 }
 0x7f9   : > { %v1446_v4 = vmul.f32 %v2367_v59, %v1444_v58  ;;  %vm1526_vm15 = vmor %vm1524_vm14, %vm1525_vm13  ;;  %vm1451_vm4 = vweird.f32 %v2367_v59 }
 0x7fa   : > { %v1521_v1 = vsub.f32 1.0, %v1520_v0  ;;  %vm1452_vm7 = vmor %vm1450_vm5, %vm1451_vm4 }
 0x7fb   : > { %v1447_v10 = vsub.f32 1.0, %v1446_v4 }
 0x7fc   : > { %v1522_v5 = vmul.f32 %v2365_v63, %v1521_v1 }
 0x7fd   : > { %v1448_v14 = vmul.f32 %v2367_v59, %v1447_v10 }
 0x7fe   : > { %v1523_v8 = vadd.f32 %v2365_v63, %v1522_v5 }
 0x7ff   : > { %v1449_v17 = vadd.f32 %v2367_v59, %v1448_v14 }
 0x800   : > { %v1527_v11 = vsel %vm1526_vm15, %v2365_v63, %v1523_v8  ;;  %v1660_v48 = vpop.xlane.xlu0 %1659 }
 0x801   : > { %v1532_v12 = vsel %vm1529_vm3, %v1531_v9, %v1527_v11  ;;  %2368 = vrcp.f32 %v1660_v48  ;;  %v1672_v21 = vand.u32 2147483648, %v1660_v48  ;;  %v1453_v22 = vsel %vm1452_vm7, %v2367_v59, %v1449_v17 }
 0x802   : > { %v1533_v13 = vmul.f32 %v2359_v43, %v1532_v12  ;;  %v1670_v24 = vand.u32 2147483647, %v1660_v48  ;;  %vm1666_vm10 = vweird.f32 %v1660_v48  ;;  %v1458_v31 = vsel %vm1455_vm9, %v1457_v26, %v1453_v22 }
 0x803   : > { %v1673_v32 = vor.u32 1.1754944e-38, %v1672_v21  ;;  %v1459_v38 = vmul.f32 %v3020_v34, %v1458_v31  ;;  %v2208_v21 = vld [vmem:[#allocation10] sm:$0xff] }
 0x804   : > { %v1534_v15 = vpack.c.bf16 %v1533_v13, %v1533_v13  ;;  %vm1671_vm14 = vcmp.eq.f32.partialorder %v1670_v24, 8.507059e+37 }
 0x805   : > { %v1460_v46 = vpack.c.bf16 %v1459_v38, %v1459_v38 }
 0x806   : > { %v1589_v7 = vpop.xlane.xlu2 %1588  ;;  %2153 = vmatmul.msk.bf16.vlgmr.msrb.gmra.mxu3 %vm1435_vm11, %v1534_v15 }
 0x807   : > { %v2369_v16 = vpop.eup %2368  ;;  %2370 = vrcp.f32 %v1589_v7  ;;  %v1601_v34 = vand.u32 2147483648, %v1589_v7  ;;  %vm1595_vm3 = vweird.f32 %v1589_v7  ;;  %v1599_v49 = vand.u32 2147483647, %v1589_v7 }
 0x808   : > { %v1662_v18 = vmul.f32 %v2369_v16, %v1660_v48  ;;  %vm1667_vm8 = vweird.f32 %v2369_v16  ;;  %v2329_v48 = vld [vmem:[%s3160_s16] ss:$0 sm:$0xff] }
 0x809   : > { %vm1668_vm13 = vmor %vm1666_vm10, %vm1667_vm8  ;;  %v1602_v51 = vor.u32 1.1754944e-38, %v1601_v34  ;;  %vm1600_vm5 = vcmp.eq.f32.partialorder %v1599_v49, 8.507059e+37 }
 0x80a   : > { %v1663_v20 = vsub.f32 1.0, %v1662_v18 }
 0x80c   : > { %v1664_v23 = vmul.f32 %v2369_v16, %v1663_v20  ;;  %v2209_v20 = vld [vmem:[#allocation10 + $0x8] sm:$0xff] }
 0x80d   : > { %v2371_v25 = vpop.eup %2370 }
 0x80e   : > { %v1665_v27 = vadd.f32 %v2369_v16, %v1664_v23  ;;  %v1591_v28 = vmul.f32 %v2371_v25, %v1589_v7  ;;  %v1678_v29 = vpop.permute.xlu2 %1677  ;;  %vm1596_vm15 = vweird.f32 %v2371_v25 }
 0x80f   : > { %v1683_v33 = vsel %vm1467_vm12, %v1678_v29, 0  ;;  %vm1597_vm4 = vmor %vm1595_vm3, %vm1596_vm15 }
 0x810   : > { %v1669_v35 = vsel %vm1668_vm13, %v2369_v16, %v1665_v27  ;;  %v1592_v36 = vsub.f32 1.0, %v1591_v28  ;;  %1692 = vmatpush.bf16.msra.mxu3 %v1683_v33  ;;  %v2330_v33 = vld [vmem:[%s3161_s17] ss:$0 sm:$0xff] }
 0x811   : > { %v1674_v37 = vsel %vm1671_vm14, %v1673_v32, %v1669_v35 }
 0x812   : > { %v1675_v40 = vmul.f32 %v3030_v52, %v1674_v37  ;;  %v1593_v42 = vmul.f32 %v2371_v25, %v1592_v36  ;;  %v2331_v36 = vld [vmem:[%s3162_s18] ss:$0 sm:$0xff] }
 0x813   : > { %v1463_v41 = vpop.permute.xlu0 %1462 }
 0x814   : > { %v1469_v43 = vsel %vm1467_vm12, %v1463_v41, 0  ;;  %v1676_v44 = vpack.c.bf16 %v1675_v40, %v1675_v40  ;;  %v1594_v47 = vadd.f32 %v2371_v25, %v1593_v42  ;;  %v2211_v42 = vld [vmem:[%s3165_s21 + $0x8] sm:$0xff] }
 0x815   : > { %1478 = vmatpush.bf16.msrb.mxu0 %v1469_v43  ;;  %v2210_v43 = vld [vmem:[%s3165_s21] sm:$0xff] }
 0x816   : > { %2157 = vmatmul.msk.bf16.vlgmr.msra.gmra.mxu3 %vm1435_vm11, %v1676_v44  ;;  %v1598_v50 = vsel %vm1597_vm4, %v2371_v25, %v1594_v47  ;;  %v2212_v25 = vld [vmem:[%s3165_s21 + $0x10] sm:$0xff]  ;;  %v2332_v44 = vld [vmem:[%s3164_s20] ss:$0 sm:$0xff] }
 0x817   : > { %v1603_v52 = vsel %vm1600_vm5, %v1602_v51, %v1598_v50  ;;  %v2333_v50 = vld [vmem:[%s3166_s22] ss:$0 sm:$0xff] }
 0x818   : > { %2151 = vmatmul.msk.bf16.vlgmr.msrb.gmra.mxu0 %vm1435_vm11, %v1460_v46  ;;  %v1604_v53 = vmul.f32 %v3034_v54, %v1603_v52  ;;  %v2207_v54 = vld [vmem:[%s3159_s15 + $0x8] sm:$0xff] }
 0x819   : > { %1621 = vmatpush.bf16.msra.mxu0 %v1612_v45  ;;  %1745 = vmatpush.bf16.msrb.mxu2 %v2207_v54 }
 0x81a   : > { %v1605_v55 = vpack.c.bf16 %v1604_v53, %v1604_v53 }
 0x81d   : > { %1746 = vmatpush.bf16.msrb.mxu2 %v2206_v3  ;;  %1814 = vmatpush.bf16.msrb.mxu0 %v2209_v20 }
 0x821   : > { %1815 = vmatpush.bf16.msrb.mxu0 %v2208_v21 }
 0x828   : > { %2155 = vmatmul.msk.bf16.vlgmr.msra.gmra.mxu0 %vm1435_vm11, %v1605_v55  ;;  %vm1859_vm11 = vcmask 523264  }
 0x889   : > { %v1552_v57 = vpop.f32.mrf.mxu3 }
 0x88a   : > { %1699 = vrot.lane.b32.xlu0 %v1552_v57, %s3237_s9  ;;  %s2099_s9 = sshll.u32 %s882_s8, 3 }
 0x88b   : > { %s884_s24 = scalar_lea.vmem [#allocation11], %s2099_s9  ;;  %s2546_s9 = scalar_lea.hbm %s3241_s1, 16 }
 0x88c   : > { %s1925_s0 = sshll.u32 %s884_s24, 4  ;;  %s1926_s0 = int_to_ptr.vmem [resolvable:$true] %s1925_s0 }
 0x891   : > { %v1554_v56 = vpop.f32.mrf.mxu3 }
 0x895   : > { %v1480_v58 = vpop.f32.mrf.mxu0 }
 0x899   : > { %v1694_v61 = vpop.f32.mrf.mxu3 }
 0x89a   : > { %1707 = vrot.lane.b32.xlu2 %v1694_v61, %s3238_s26  ;;  %s2194_s26 = sshll.u32 %s2776_s7, 3  ;;  %s1913_s7 = scalar_lea.sflag [#allocation4], %s882_s8 }
 0x89b   : > { %s1923_s5 = scalar_lea.hbm %s3241_s1, %s2194_s26 }
 0x89c   : > { %s1927_s6 = sshll.u32 %s1923_s5, 4  ;;  %s1928_s6 = int_to_ptr.hbm [resolvable:$true] %s1927_s6 }
 0x89d   : > { %v1482_v63 = vpop.f32.mrf.mxu0  ;;  %s2540_s29 = sshra.s32 %s1928_s6, 4  ;;  %s2541_s29 = int_to_ptr.hbm [resolvable:$true] %s2540_s29 }
 0x89e   : > { %p2547_p3 = scmp.lt.s32.totalorder %s2541_s29, %s3241_s1 }
 0x8a1   : > { %v1696_v0 = vpop.f32.mrf.mxu3 }
 0x8a5   : > { %v1623_v59 = vpop.f32.mrf.mxu0 }
 0x8a6   : > { %1703 = vrot.lane.b32.xlu1 %v1623_v59, %s3239_s3  ;;  %s2542_s3 = scalar_lea.hbm %s2541_s29, 8 }
 0x8a7   : > { %p2543_p0 = scmp.ne.s32.totalorder %s2541_s29, %s2542_s3  ;;  %p2548_p4 = scmp.lt.s32.totalorder %s2546_s9, %s2542_s3 }
 0x8a9   : > { %p2544_p1 = pnand %p2543_p0, %p2793_p5  ;;  %p2549_p7 = por %p2548_p4, %p2547_p3 }
 0x8ab   : > { %p2545_p2 = pneg %p2544_p1 }
 0x8ad   : > { %v1625_v1 = vpop.f32.mrf.mxu0  ;;  %p2550_p8 = pnand %p2549_p7, %p2545_p2 }
 0x8f4   : > { %v1708_v8 = vpop.permute.xlu2 %1707 }
 0x8fc   : > { %v1700_v4 = vpop.permute.xlu0 %1699 }
 0x8fd   : > { %v1710_v5 = vsel %vm955_vm1, %v1480_v58, %v1700_v4 }
 0x918   : > { %v1704_v6 = vpop.permute.xlu1 %1703 }
 0x919   : > { %v1711_v9 = vsel %vm1250_vm2, %v1710_v5, %v1704_v6 }
 0x91a   : > { %v1712_v10 = vsel %vm1252_vm6, %v1711_v9, %v1708_v8 }
 0x91b   : > { %v1720_v11 = vpack.c.bf16 %v1712_v10, %v1712_v10  ;;  %v2334_v10 = vld [vmem:[%s3167_s23] ss:$0 sm:$0xff] }
 0x91d   : > { %2166 = vmatmul.msk.bf16.vlgmr.msrb.gmra.mxu2 %vm934_vm0, %v1720_v11 }
 0x9a0   : > { %v1748_v12 = vpop.f32.mrf.mxu2 }
 0x9a1   : > { %v1749_v13 = vadd.f32 %v2329_v48, %v1748_v12  ;;  %v2335_v48 = vld [vmem:[%s3240_s28] ss:$0 sm:$0xff] }
 0x9a3   : > { %v1752_v14 = vadd.f32 %v1749_v13, %v2996_v62  ;;  %v2213_v62 = vld [vmem:[%s3165_s21 + $0x18] sm:$0xff] }
 0x9a4   : > { %1867 = vmatpush.bf16.msrb.mxu1 %v2213_v62 }
 0x9a5   : > { %v1753_v15 = vsel %vm934_vm0, %v1752_v14, 0.0 }
 0x9a6   : > { %1754 = vadd.xlane.f32.xlu0 %v1753_v15 }
 0x9a8   : > { %v1750_v7 = vpop.f32.mrf.mxu2  ;;  %1868 = vmatpush.bf16.msrb.mxu1 %v2212_v25 }
 0x9ac   : > { %1869 = vmatpush.bf16.msrb.mxu1 %v2211_v42 }
 0x9b0   : > { %1870 = vmatpush.bf16.msrb.mxu1 %v2210_v43 }
 0xa19   : > { %v1755_v16 = vpop.xlane.xlu0 %1754 }
 0xa1a   : > { %v1756_v17 = vmul.f32 %v1755_v16, %v2971_v30 }
 0xa1c   : > { %v1757_v18 = vsub.f32 %v1752_v14, %v1756_v17 }
 0xa1e   : > { %v1758_v19 = vmul.f32 %v1757_v18, %v1757_v18 }
 0xa20   : > { %v1759_v2 = vsel %vm934_vm0, %v1758_v19, 0.0 }
 0xa21   : > { %1760 = vadd.xlane.f32.xlu1 %v1759_v2 }
 0xa94   : > { %v1761_v22 = vpop.xlane.xlu1 %1760 }
 0xa95   : > { %v1762_v23 = vmul.f32 %v1761_v22, %v2971_v30 }
 0xa97   : > { %v1763_v24 = vadd.f32 1e-05, %v1762_v23 }
 0xa99   : > { %2372 = vrsqrt.f32 %v1763_v24  ;;  %vm1770_vm2 = vweird.f32 %v1763_v24 }
 0xa9f   : > { %v2373_v26 = vpop.eup %2372 }
 0xaa0   : > { %v1765_v27 = vmul.f32 %v2373_v26, %v1763_v24  ;;  %vm1771_vm1 = vweird.f32 %v2373_v26 }
 0xaa1   : > { %vm1772_vm6 = vmor %vm1770_vm2, %vm1771_vm1 }
 0xaa2   : > { %v1766_v28 = vmul.f32 %v2373_v26, %v1765_v27 }
 0xaa4   : > { %v1767_v29 = vmul.f32 0.5, %v1766_v28 }
 0xaa6   : > { %v1768_v31 = vsub.f32 1.5, %v1767_v29 }
 0xaa8   : > { %v1769_v32 = vmul.f32 %v2373_v26, %v1768_v31 }
 0xaaa   : > { %v1773_v35 = vsel %vm1772_vm6, %v2373_v26, %v1769_v32 }
 0xaab   : > { %v1774_v37 = vmul.f32 %v1773_v35, %v1757_v18 }
 0xaad   : > { %v1778_v38 = vmul.f32 %v2330_v33, %v1774_v37 }
 0xaaf   : > { %v1782_v39 = vadd.f32 %v2331_v36, %v1778_v38 }
 0xab1   : > { %v1783_v40 = vmul.f32 %v1782_v39, %v2993_v60 }
 0xab3   : > { %v1789_v41 = vpack.c.bf16 %v1783_v40, %v1783_v40 }
 0xab5   : > { %2175 = vmatmul.msk.bf16.vlgmr.msrb.gmra.mxu0 %vm934_vm0, %v1789_v41 }
 0xb32   : > { %v1817_v45 = vpop.f32.mrf.mxu0 }
 0xb33   : > { %v1818_v46 = vadd.f32 %v2332_v44, %v1817_v45 }
 0xb35   : > { %v1821_v47 = vmax.f32 %v1818_v46, 0.0 }
 0xb37   : > { %v1831_v34 = vpack.c.bf16 %v1821_v47, %v1821_v47 }
 0xb39   : > { %2192 = vmatmul.msk.bf16.vlgmr.msrb.gmra.mxu1 %vm1859_vm11, %v1831_v34 }
 0xb3a   : > { %v1819_v49 = vpop.f32.mrf.mxu0 }
 0xbb6   : > { %v1872_v51 = vpop.f32.mrf.mxu1 }
 0xbb7   : > { %v1873_v52 = vadd.f32 %v2333_v50, %v1872_v51 }
 0xbb9   : > { %v1876_v53 = vadd.f32 %v1873_v52, %v1783_v40 }
 0xbbb   : > { %v1879_v55 = vsel %vm934_vm0, %v1876_v53, 0.0 }
 0xbbc   : > { %1880 = vadd.xlane.f32.xlu2 %v1879_v55 }
 0xbbe   : > { %v1874_v57 = vpop.f32.mrf.mxu1 }
 0xc2f   : > { %v1881_v56 = vpop.xlane.xlu2 %1880 }
 0xc30   : > { %v1882_v58 = vmul.f32 %v1881_v56, %v2971_v30 }
 0xc32   : > { %v1883_v61 = vsub.f32 %v1876_v53, %v1882_v58 }
 0xc34   : > { %v1884_v63 = vmul.f32 %v1883_v61, %v1883_v61 }
 0xc36   : > { %v1885_v0 = vsel %vm934_vm0, %v1884_v63, 0.0 }
 0xc37   : > { %1886 = vadd.xlane.f32.xlu0 %v1885_v0 }
 0xcaa   : > { %v1887_v59 = vpop.xlane.xlu0 %1886 }
 0xcab   : > { %v1888_v1 = vmul.f32 %v1887_v59, %v2971_v30 }
 0xcad   : > { %v1889_v54 = vadd.f32 1e-05, %v1888_v1 }
 0xcaf   : > { %2374 = vrsqrt.f32 %v1889_v54  ;;  %vm1896_vm7 = vweird.f32 %v1889_v54 }
 0xcb5   : > { %v2375_v3 = vpop.eup %2374 }
 0xcb6   : > { %v1891_v4 = vmul.f32 %v2375_v3, %v1889_v54  ;;  %vm1897_vm12 = vweird.f32 %v2375_v3 }
 0xcb7   : > { %vm1898_vm8 = vmor %vm1896_vm7, %vm1897_vm12 }
 0xcb8   : > { %v1892_v5 = vmul.f32 %v2375_v3, %v1891_v4 }
 0xcba   : > { %v1893_v6 = vmul.f32 0.5, %v1892_v5 }
 0xcbc   : > { %v1894_v8 = vsub.f32 1.5, %v1893_v6 }
 0xcbe   : > { %v1895_v9 = vmul.f32 %v2375_v3, %v1894_v8 }
 0xcc0   : > { %v1899_v11 = vsel %vm1898_vm8, %v2375_v3, %v1895_v9 }
 0xcc1   : > { %v1900_v30 = vmul.f32 %v1899_v11, %v1883_v61 }
 0xcc3   : > { %v1904_v12 = vmul.f32 %v2334_v10, %v1900_v30 }
 0xcc5   : > { %v1908_v13 = vadd.f32 %v2335_v48, %v1904_v12 }
 0xcc7   : > { %v1909_v14 = vmul.f32 %v1908_v13, %v2993_v60 }
 0xcc9   : > { %v1910_v15 = vsel %vm934_vm0, %v1909_v14, 0.0 }
 0xcca   : > { %1911 = vst [vmem:[%s884_s24] sm:$0xff] %v1910_v15 }
 0xccb   : > { %2553 = shalt.err (!%p2550_p8)
}
 0xccc   : > { %2234 = dma.vmem_to_hbm [thread:$0]  (%p2793_p5), %s1926_s0, 128, %s1928_s6, %s1913_s7  }
 0xccd PF: > { %s3243_s8 = sld [smem:[#allocation18_spill]] }
 0xcce   : > { %s3244_s30 = sld [smem:[#allocation16_spill]] }
 0xcd3   : > { %p2266_p9 = scmp.ge.s32.totalorder %s3243_s8, 2 }
 0xcd4   : > { %s1939_s24 = sand.u32 1, %s3244_s30  }
 0xcd5   : > { %p2253_p10 = pnand %p2266_p9, %p2797_p6  ;;  %s1940_s26 = scalar_lea.sflag [#allocation4], %s1939_s24 }
 0xcd7   : > { %p2254_p11 = pneg %p2253_p10 }
 0xcd9   : > { %2583 = dma.done.wait (%p2254_p11), %s1940_s26, 128  }
 0xcda   : > { %2585 = vsyncadd (%p2254_p11), %s1940_s26, 4294967168  ;;  %s3246_s30 = sld [smem:[#allocation19_spill]]  ;;  %s3249_s29 = smov %s2592_s2 }
 0xcdb   : > { %s3247_s3 = sld [smem:[#allocation17_spill]] }
 0xcdc   : > { %s3248_s6 = sld [smem:[#allocation20_spill]] }
 0xce0   : > { %p38_p12 = scmp.ge.s32.totalorder %s3246_s30, 4  }
 0xce1   : > { %s3250_s2 = smov %s3247_s3 }
 0xce2   :  { %40 = sbr.rel (!%p38_p12) target bundleno = 20 (0x14), region = 188 }
 0xce7   :  { %1946 = vsyncpa [#allocation3], 1 }
 0xce8   :  { %1948 = vsyncpa [#allocation3 + $0x1], 1 }
 0xce9   :  { %1949 = vsyncpa [#allocation6], 1 }
 0xcea   :  { %1950 = vsyncpa [#allocation9], 1 }
 0xceb   :  { %1951 = vsyncpa [#allocation4], 1 }
 0xcec   :  { %1953 = vsyncpa [#allocation4 + $0x1], 1 }

</bundles_post_ra>
